<compile_context>
chip_gen: v5e
topology: v5e:2x2
jax: 0.10.0
libtpu: 0.0.40
codegen_flags: <defaults>
</compile_context>

<pallas_src>
import jax
import jax.numpy as jnp
import numpy as np
from jax.experimental import pallas as pl
from jax.experimental.pallas import tpu as pltpu


# ----------------------------------------------------------------------------
# Kernel 1: fused LSTM (input projection for all T + sequential recurrence)
# ----------------------------------------------------------------------------
def _lstm_kernel(x_ref, wih_ref, whh_ref, bias_ref, h0_ref, c0_ref,
                 seq_ref, hn_ref, cn_ref, xg_ref):
    """One whole LSTM layer in a single kernel invocation.

    x_ref   : (T, B, E)  time-major embedded inputs
    wih_ref : (E, 4H)    transposed PyTorch W_ih
    whh_ref : (H, 4H)    transposed PyTorch W_hh
    bias_ref: (1, 4H)    b_ih + b_hh
    h0_ref  : (B, H)     initial hidden state
    c0_ref  : (B, H)     initial cell state
    seq_ref : (T, B, H)  all hidden states (output, time-major)
    hn_ref  : (B, H)     final hidden state (output)
    cn_ref  : (B, H)     final cell state (output)
    xg_ref  : (T, B, 4H) VMEM scratch holding the hoisted input projections
    """
    T = x_ref.shape[0]
    H = h0_ref.shape[1]

    wih = wih_ref[...]
    bias = bias_ref[...]
    # Hoisted input-side projections: independent of the recurrence carry, so
    # these T small MXU dots are free to overlap / pipeline ahead of the
    # carry-dependent chain below.  Static trip count -> static ref indices.
    for t in range(T):
        xg_ref[t] = (
            jnp.dot(x_ref[t], wih, preferred_element_type=jnp.float32) + bias
        )

    whh = whh_ref[...]  # loaded once for the whole recurrence

    def step(t, carry):
        h, c = carry
        # Exactly one carry-dependent MXU dot per step.
        gates = xg_ref[t] + jnp.dot(h, whh, preferred_element_type=jnp.float32)  # (B, 4H)
        # Full lane-width nonlinearities (EUP), then static lane slices
        # in PyTorch gate order i, f, g, o.
        sig = jax.nn.sigmoid(gates)
        th = jnp.tanh(gates)
        i_g = sig[:, 0 * H:1 * H]
        f_g = sig[:, 1 * H:2 * H]
        g_g = th[:, 2 * H:3 * H]
        o_g = sig[:, 3 * H:4 * H]
        c_new = f_g * c + i_g * g_g
        h_new = o_g * jnp.tanh(c_new)
        seq_ref[t] = h_new
        return (h_new, c_new)

    h_fin, c_fin = jax.lax.fori_loop(
        0, T, step, (h0_ref[...], c0_ref[...]), unroll=True
    )
    hn_ref[...] = h_fin
    cn_ref[...] = c_fin


def _lstm(x_tm, w_ih, w_hh, b_ih, b_hh, h0, c0):
    """x_tm: (T, B, E) time-major embedded inputs. Returns (seq, h_n, c_n)."""
    T, B, _ = x_tm.shape
    H = w_hh.shape[1]
    bias = (b_ih + b_hh).astype(jnp.float32)[None, :]  # (1, 4H)
    return pl.pallas_call(
        _lstm_kernel,
        out_shape=(
            jax.ShapeDtypeStruct((T, B, H), jnp.float32),  # all hidden states
            jax.ShapeDtypeStruct((B, H), jnp.float32),     # h_n
            jax.ShapeDtypeStruct((B, H), jnp.float32),     # c_n
        ),
        scratch_shapes=[pltpu.VMEM((T, B, 4 * H), jnp.float32)],
    )(
        x_tm.astype(jnp.float32),
        jnp.transpose(w_ih).astype(jnp.float32),
        jnp.transpose(w_hh).astype(jnp.float32),
        bias,
        h0.astype(jnp.float32),
        c0.astype(jnp.float32),
    )


# ----------------------------------------------------------------------------
# Kernel 2: fused Linear(H, V) + CrossEntropyLoss(mean)
# ----------------------------------------------------------------------------
def _classifier_ce_kernel(x_ref, w_ref, b_ref, lbl_ref, loss_ref):
    """x:(N,H) @ w:(H,V) + b:(1,V) -> logits; mean CE vs lbl:(N,1) -> loss:(1,1)."""
    logits = (
        jnp.dot(x_ref[...], w_ref[...], preferred_element_type=jnp.float32)
        + b_ref[...]
    )  # (N, V)
    N, V = logits.shape
    m = jnp.max(logits, axis=-1, keepdims=True)                       # (N, 1)
    lse = m + jnp.log(jnp.sum(jnp.exp(logits - m), axis=-1, keepdims=True))
    one_hot = (
        jax.lax.broadcasted_iota(jnp.int32, (N, V), 1) == lbl_ref[...]
    ).astype(jnp.float32)
    tgt = jnp.sum(logits * one_hot, axis=-1, keepdims=True)           # (N, 1)
    loss_ref[...] = jnp.sum(lse - tgt, axis=0, keepdims=True) * (1.0 / N)


def _classifier_ce(x, w_t, b, labels):
    return pl.pallas_call(
        _classifier_ce_kernel,
        out_shape=jax.ShapeDtypeStruct((1, 1), jnp.float32),
    )(x.astype(jnp.float32), w_t.astype(jnp.float32),
      b.astype(jnp.float32), labels.astype(jnp.int32))


# ----------------------------------------------------------------------------
# Seq2Seq.forward
# ----------------------------------------------------------------------------
@jax.jit
def seq2seq_forward(params, inputs_tensor, targets_tensor):
    """Pallas equivalent of Seq2Seq.forward: returns the scalar cross-entropy loss."""
    decoder_input = targets_tensor[:, :-1]
    label = targets_tensor[:, 1:]

    B = inputs_tensor.shape[0]
    Td = decoder_input.shape[1]
    H = params["w_hh_enc"].shape[1]

    def embed_time_major(emb, idx):
        # Embedding gather + layout glue stay in the wrapper (plain JAX); all
        # matmuls / recurrence / loss run inside the Pallas kernels.
        x = jnp.take(emb, idx, axis=0).astype(jnp.float32)  # (B, T, E)
        return jnp.transpose(x, (1, 0, 2))                   # (T, B, E)

    # ---- Encoder: zero initial state, keep only (h_n, c_n) ----
    zeros = jnp.zeros((B, H), jnp.float32)
    _, h_n, c_n = _lstm(
        embed_time_major(params["emb_enc"], inputs_tensor),
        params["w_ih_enc"], params["w_hh_enc"],
        params["b_ih_enc"], params["b_hh_enc"], zeros, zeros,
    )

    # ---- Decoder: initial state = encoder hidden, keep the full sequence ----
    dec_seq, _, _ = _lstm(
        embed_time_major(params["emb_dec"], decoder_input),
        params["w_ih_dec"], params["w_hh_dec"],
        params["b_ih_dec"], params["b_hh_dec"], h_n, c_n,
    )  # (Td, B, H)

    # ---- Classifier + CrossEntropy (mean over all (t, b) positions) ----
    # dec_seq is time-major, so flatten labels time-major too (mean CE is
    # invariant to the row order as long as logits/labels stay paired).
    labels_tm = jnp.transpose(label).reshape(Td * B, 1).astype(jnp.int32)
    loss = _classifier_ce(
        dec_seq.reshape(Td * B, H),
        jnp.transpose(params["w_cls"]),
        params["b_cls"][None, :],
        labels_tm,
    )
    return loss[0, 0]


# ----------------------------------------------------------------------------
# Pure-JAX reference (matches torch semantics: nn.LSTM batch_first, gate order
# i,f,g,o, bias = b_ih + b_hh; nn.CrossEntropyLoss mean reduction).
# ----------------------------------------------------------------------------
def _reference_loss(params, inputs_tensor, targets_tensor):
    decoder_input = targets_tensor[:, :-1]
    label = targets_tensor[:, 1:]

    def lstm(x_bte, w_ih, w_hh, b_ih, b_hh, h0, c0):
        def step(carry, x_t):
            h, c = carry
            gates = x_t @ w_ih.T + h @ w_hh.T + b_ih + b_hh
            i, f, g, o = jnp.split(gates, 4, axis=-1)
            i = jax.nn.sigmoid(i)
            f = jax.nn.sigmoid(f)
            g = jnp.tanh(g)
            o = jax.nn.sigmoid(o)
            c = f * c + i * g
            h = o * jnp.tanh(c)
            return (h, c), h

        (h, c), ys = jax.lax.scan(step, (h0, c0), jnp.swapaxes(x_bte, 0, 1))
        return ys, h, c

    B = inputs_tensor.shape[0]
    H = params["w_hh_enc"].shape[1]
    zeros = jnp.zeros((B, H), jnp.float32)
    _, h_n, c_n = lstm(params["emb_enc"][inputs_tensor],
                       params["w_ih_enc"], params["w_hh_enc"],
                       params["b_ih_enc"], params["b_hh_enc"], zeros, zeros)
    ys, _, _ = lstm(params["emb_dec"][decoder_input],
                    params["w_ih_dec"], params["w_hh_dec"],
                    params["b_ih_dec"], params["b_hh_dec"], h_n, c_n)
    logits = ys @ params["w_cls"].T + params["b_cls"]          # (Td, B, V)
    V = logits.shape[-1]
    logits_flat = logits.reshape(-1, V)
    labels_flat = jnp.swapaxes(label, 0, 1).reshape(-1)
    lse = jax.scipy.special.logsumexp(logits_flat, axis=-1)
    tgt = jnp.take_along_axis(logits_flat, labels_flat[:, None], axis=-1)[:, 0]
    return jnp.mean(lse - tgt)


if __name__ == "__main__":
    # Small, module-consistent shapes: Seq2Seq(16, 32, 16, 32, corpus_len=32),
    # batch=2, source seq=8, target seq=8 (decoder length 7).
    corpus_len = 32      # V
    enc_embed = 16       # encoder_embedding_num
    dec_embed = 16       # decoder_embedding_num
    hidden = 32          # encoder_hidden_num == decoder_hidden_num
    batch = 2
    src_len = 8
    tgt_len = 8

    key = jax.random.PRNGKey(0)
    ks = jax.random.split(key, 14)
    bound = 1.0 / np.sqrt(hidden)

    def uni(k, shape):
        return jax.random.uniform(k, shape, jnp.float32, -bound, bound)

    params = {
        "emb_enc": jax.random.normal(ks[0], (corpus_len, enc_embed), jnp.float32),
        "w_ih_enc": uni(ks[1], (4 * hidden, enc_embed)),
        "w_hh_enc": uni(ks[2], (4 * hidden, hidden)),
        "b_ih_enc": uni(ks[3], (4 * hidden,)),
        "b_hh_enc": uni(ks[4], (4 * hidden,)),
        "emb_dec": jax.random.normal(ks[5], (corpus_len, dec_embed), jnp.float32),
        "w_ih_dec": uni(ks[6], (4 * hidden, dec_embed)),
        "w_hh_dec": uni(ks[7], (4 * hidden, hidden)),
        "b_ih_dec": uni(ks[8], (4 * hidden,)),
        "b_hh_dec": uni(ks[9], (4 * hidden,)),
        "w_cls": uni(ks[10], (corpus_len, hidden)),
        "b_cls": uni(ks[11], (corpus_len,)),
    }

    inputs_tensor = jax.random.randint(ks[12], (batch, src_len), 0, corpus_len, jnp.int32)
    targets_tensor = jax.random.randint(ks[13], (batch, tgt_len), 0, corpus_len, jnp.int32)

    loss = seq2seq_forward(params, inputs_tensor, targets_tensor)
    jax.block_until_ready(loss)

    loss_ref = _reference_loss(params, inputs_tensor, targets_tensor)
    np.testing.assert_allclose(np.asarray(loss), np.asarray(loss_ref), rtol=1e-4, atol=1e-4)
    assert np.isfinite(float(loss))

    # TODO(synk): Seq2Seq.predict() (host-driven greedy decode with a data-dependent
    # while/break) is inference-only and not part of forward(); not implemented here.

    print("KERNEL_OK")
</pallas_src>

<mosaic_0001>
module attributes {stable_mosaic.version = 11 : i64} {
  func.func @_classifier_ce_kernel(%arg0: memref<14x32xf32, #tpu.memory_space<vmem>>, %arg1: memref<32x32xf32, #tpu.memory_space<vmem>>, %arg2: memref<1x32xf32, #tpu.memory_space<vmem>>, %arg3: memref<14x1xi32, #tpu.memory_space<vmem>>, %arg4: memref<1x1xf32, #tpu.memory_space<vmem>>) attributes {dimension_semantics = [], scalar_prefetch = 0 : i64, scratch_operands = 0 : i64, tpu.core_type = #tpu.core_type<tc>} {
    %c0 = arith.constant 0 : index
    %c0_0 = arith.constant 0 : index
    %0 = vector.load %arg0[%c0, %c0_0] : memref<14x32xf32, #tpu.memory_space<vmem>>, vector<14x32xf32>
    %c0_1 = arith.constant 0 : index
    %c0_2 = arith.constant 0 : index
    %1 = vector.load %arg1[%c0_1, %c0_2] : memref<32x32xf32, #tpu.memory_space<vmem>>, vector<32x32xf32>
    %cst = arith.constant dense<0.000000e+00> : vector<14x32xf32>
    %2 = tpu.matmul %0, %1, %cst {dimension_numbers = #tpu.dot_dimension_numbers<[1], [0], [0], [1], [0, 0, 1, 1], [], []>} : vector<14x32xf32>, vector<32x32xf32>, vector<14x32xf32> -> vector<14x32xf32>
    %c0_3 = arith.constant 0 : index
    %c0_4 = arith.constant 0 : index
    %3 = vector.load %arg2[%c0_3, %c0_4] : memref<1x32xf32, #tpu.memory_space<vmem>>, vector<1x32xf32>
    %4 = vector.broadcast %3 : vector<1x32xf32> to vector<14x32xf32>
    %5 = arith.addf %2, %4 : vector<14x32xf32>
    %cst_5 = arith.constant dense<0xFF800000> : vector<14xf32>
    %6 = vector.multi_reduction <maximumf>, %5, %cst_5 [1] : vector<14x32xf32> to vector<14xf32>
    %7 = vector.shape_cast %6 : vector<14xf32> to vector<14x1xf32>
    %8 = vector.broadcast %7 : vector<14x1xf32> to vector<14x32xf32>
    %9 = arith.subf %5, %8 : vector<14x32xf32>
    %10 = math.exp %9 : vector<14x32xf32>
    %cst_6 = arith.constant dense<0.000000e+00> : vector<14xf32>
    %11 = vector.multi_reduction <add>, %10, %cst_6 [1] : vector<14x32xf32> to vector<14xf32>
    %12 = vector.shape_cast %11 : vector<14xf32> to vector<14x1xf32>
    %13 = math.log %12 : vector<14x1xf32>
    %14 = arith.addf %7, %13 : vector<14x1xf32>
    %15 = tpu.iota {dimensions = array<i32: 1>} : vector<14x32xi32>
    %c0_7 = arith.constant 0 : index
    %c0_8 = arith.constant 0 : index
    %16 = vector.load %arg3[%c0_7, %c0_8] : memref<14x1xi32, #tpu.memory_space<vmem>>, vector<14x1xi32>
    %17 = vector.broadcast %16 : vector<14x1xi32> to vector<14x32xi32>
    %18 = arith.cmpi eq, %15, %17 : vector<14x32xi32>
    %19 = arith.extui %18 : vector<14x32xi1> to vector<14x32xi32>
    %20 = arith.sitofp %19 : vector<14x32xi32> to vector<14x32xf32>
    %21 = arith.mulf %5, %20 : vector<14x32xf32>
    %cst_9 = arith.constant dense<0.000000e+00> : vector<14xf32>
    %22 = vector.multi_reduction <add>, %21, %cst_9 [1] : vector<14x32xf32> to vector<14xf32>
    %23 = vector.shape_cast %22 : vector<14xf32> to vector<14x1xf32>
    %24 = arith.subf %14, %23 : vector<14x1xf32>
    %cst_10 = arith.constant dense<0.000000e+00> : vector<1xf32>
    %25 = vector.multi_reduction <add>, %24, %cst_10 [0] : vector<14x1xf32> to vector<1xf32>
    %26 = vector.shape_cast %25 : vector<1xf32> to vector<1x1xf32>
    %cst_11 = arith.constant 0.0714285746 : f32
    %27 = vector.broadcast %cst_11 : f32 to vector<1x1xf32>
    %28 = arith.mulf %26, %27 : vector<1x1xf32>
    %c0_12 = arith.constant 0 : index
    %c0_13 = arith.constant 0 : index
    %29 = vector.load %arg4[%c0_12, %c0_13] : memref<1x1xf32, #tpu.memory_space<vmem>>, vector<1x1xf32>
    tpu.vector_store %arg4[%c0_12, %c0_13], %28 {strides = array<i32>} : memref<1x1xf32, #tpu.memory_space<vmem>>, vector<1x1xf32>,
    return
  }
}

module attributes {stable_mosaic.version = 11 : i64} {
  func.func @_lstm_kernel(%arg0: memref<7x2x16xf32, #tpu.memory_space<vmem>>, %arg1: memref<16x128xf32, #tpu.memory_space<vmem>>, %arg2: memref<32x128xf32, #tpu.memory_space<vmem>>, %arg3: memref<1x128xf32, #tpu.memory_space<vmem>>, %arg4: memref<2x32xf32, #tpu.memory_space<vmem>>, %arg5: memref<2x32xf32, #tpu.memory_space<vmem>>, %arg6: memref<7x2x32xf32, #tpu.memory_space<vmem>>, %arg7: memref<2x32xf32, #tpu.memory_space<vmem>>, %arg8: memref<2x32xf32, #tpu.memory_space<vmem>>, %arg9: memref<7x2x128xf32, #tpu.memory_space<vmem>>) attributes {dimension_semantics = [], scalar_prefetch = 0 : i64, scratch_operands = 1 : i64, tpu.core_type = #tpu.core_type<tc>} {
    %c0 = arith.constant 0 : index
    %c0_0 = arith.constant 0 : index
    %0 = vector.load %arg1[%c0, %c0_0] : memref<16x128xf32, #tpu.memory_space<vmem>>, vector<16x128xf32>
    %c0_1 = arith.constant 0 : index
    %c0_2 = arith.constant 0 : index
    %1 = vector.load %arg3[%c0_1, %c0_2] : memref<1x128xf32, #tpu.memory_space<vmem>>, vector<1x128xf32>
    %c0_3 = arith.constant 0 : index
    %c0_4 = arith.constant 0 : index
    %c0_5 = arith.constant 0 : index
    %2 = vector.load %arg0[%c0_3, %c0_4, %c0_5] : memref<7x2x16xf32, #tpu.memory_space<vmem>>, vector<1x2x16xf32>
    %3 = vector.shape_cast %2 : vector<1x2x16xf32> to vector<2x16xf32>
    %cst = arith.constant dense<0.000000e+00> : vector<2x128xf32>
    %4 = tpu.matmul %3, %0, %cst {dimension_numbers = #tpu.dot_dimension_numbers<[1], [0], [0], [1], [0, 0, 1, 1], [], []>} : vector<2x16xf32>, vector<16x128xf32>, vector<2x128xf32> -> vector<2x128xf32>
    %5 = vector.broadcast %1 : vector<1x128xf32> to vector<2x128xf32>
    %6 = arith.addf %4, %5 : vector<2x128xf32>
    %c0_6 = arith.constant 0 : index
    %c0_7 = arith.constant 0 : index
    %c0_8 = arith.constant 0 : index
    %7 = vector.load %arg9[%c0_6, %c0_7, %c0_8] : memref<7x2x128xf32, #tpu.memory_space<vmem>>, vector<1x2x128xf32>
    %8 = vector.shape_cast %7 : vector<1x2x128xf32> to vector<2x128xf32>
    %9 = vector.shape_cast %6 : vector<2x128xf32> to vector<1x2x128xf32>
    tpu.vector_store %arg9[%c0_6, %c0_7, %c0_8], %9 {strides = array<i32>} : memref<7x2x128xf32, #tpu.memory_space<vmem>>, vector<1x2x128xf32>,
    %c1 = arith.constant 1 : index
    %c0_9 = arith.constant 0 : index
    %c0_10 = arith.constant 0 : index
    %10 = vector.load %arg0[%c1, %c0_9, %c0_10] : memref<7x2x16xf32, #tpu.memory_space<vmem>>, vector<1x2x16xf32>
    %11 = vector.shape_cast %10 : vector<1x2x16xf32> to vector<2x16xf32>
    %cst_11 = arith.constant dense<0.000000e+00> : vector<2x128xf32>
    %12 = tpu.matmul %11, %0, %cst_11 {dimension_numbers = #tpu.dot_dimension_numbers<[1], [0], [0], [1], [0, 0, 1, 1], [], []>} : vector<2x16xf32>, vector<16x128xf32>, vector<2x128xf32> -> vector<2x128xf32>
    %13 = vector.broadcast %1 : vector<1x128xf32> to vector<2x128xf32>
    %14 = arith.addf %12, %13 : vector<2x128xf32>
    %c1_12 = arith.constant 1 : index
    %c0_13 = arith.constant 0 : index
    %c0_14 = arith.constant 0 : index
    %15 = vector.load %arg9[%c1_12, %c0_13, %c0_14] : memref<7x2x128xf32, #tpu.memory_space<vmem>>, vector<1x2x128xf32>
    %16 = vector.shape_cast %15 : vector<1x2x128xf32> to vector<2x128xf32>
    %17 = vector.shape_cast %14 : vector<2x128xf32> to vector<1x2x128xf32>
    tpu.vector_store %arg9[%c1_12, %c0_13, %c0_14], %17 {strides = array<i32>} : memref<7x2x128xf32, #tpu.memory_space<vmem>>, vector<1x2x128xf32>,
    %c2 = arith.constant 2 : index
    %c0_15 = arith.constant 0 : index
    %c0_16 = arith.constant 0 : index
    %18 = vector.load %arg0[%c2, %c0_15, %c0_16] : memref<7x2x16xf32, #tpu.memory_space<vmem>>, vector<1x2x16xf32>
    %19 = vector.shape_cast %18 : vector<1x2x16xf32> to vector<2x16xf32>
    %cst_17 = arith.constant dense<0.000000e+00> : vector<2x128xf32>
    %20 = tpu.matmul %19, %0, %cst_17 {dimension_numbers = #tpu.dot_dimension_numbers<[1], [0], [0], [1], [0, 0, 1, 1], [], []>} : vector<2x16xf32>, vector<16x128xf32>, vector<2x128xf32> -> vector<2x128xf32>
    %21 = vector.broadcast %1 : vector<1x128xf32> to vector<2x128xf32>
    %22 = arith.addf %20, %21 : vector<2x128xf32>
    %c2_18 = arith.constant 2 : index
    %c0_19 = arith.constant 0 : index
    %c0_20 = arith.constant 0 : index
    %23 = vector.load %arg9[%c2_18, %c0_19, %c0_20] : memref<7x2x128xf32, #tpu.memory_space<vmem>>, vector<1x2x128xf32>
    %24 = vector.shape_cast %23 : vector<1x2x128xf32> to vector<2x128xf32>
    %25 = vector.shape_cast %22 : vector<2x128xf32> to vector<1x2x128xf32>
    tpu.vector_store %arg9[%c2_18, %c0_19, %c0_20], %25 {strides = array<i32>} : memref<7x2x128xf32, #tpu.memory_space<vmem>>, vector<1x2x128xf32>,
    %c3 = arith.constant 3 : index
    %c0_21 = arith.constant 0 : index
    %c0_22 = arith.constant 0 : index
    %26 = vector.load %arg0[%c3, %c0_21, %c0_22] : memref<7x2x16xf32, #tpu.memory_space<vmem>>, vector<1x2x16xf32>
    %27 = vector.shape_cast %26 : vector<1x2x16xf32> to vector<2x16xf32>
    %cst_23 = arith.constant dense<0.000000e+00> : vector<2x128xf32>
    %28 = tpu.matmul %27, %0, %cst_23 {dimension_numbers = #tpu.dot_dimension_numbers<[1], [0], [0], [1], [0, 0, 1, 1], [], []>} : vector<2x16xf32>, vector<16x128xf32>, vector<2x128xf32> -> vector<2x128xf32>
    %29 = vector.broadcast %1 : vector<1x128xf32> to vector<2x128xf32>
    %30 = arith.addf %28, %29 : vector<2x128xf32>
    %c3_24 = arith.constant 3 : index
    %c0_25 = arith.constant 0 : index
    %c0_26 = arith.constant 0 : index
    %31 = vector.load %arg9[%c3_24, %c0_25, %c0_26] : memref<7x2x128xf32, #tpu.memory_space<vmem>>, vector<1x2x128xf32>
    %32 = vector.shape_cast %31 : vector<1x2x128xf32> to vector<2x128xf32>
    %33 = vector.shape_cast %30 : vector<2x128xf32> to vector<1x2x128xf32>
    tpu.vector_store %arg9[%c3_24, %c0_25, %c0_26], %33 {strides = array<i32>} : memref<7x2x128xf32, #tpu.memory_space<vmem>>, vector<1x2x128xf32>,
    %c4 = arith.constant 4 : index
    %c0_27 = arith.constant 0 : index
    %c0_28 = arith.constant 0 : index
    %34 = vector.load %arg0[%c4, %c0_27, %c0_28] : memref<7x2x16xf32, #tpu.memory_space<vmem>>, vector<1x2x16xf32>
    %35 = vector.shape_cast %34 : vector<1x2x16xf32> to vector<2x16xf32>
    %cst_29 = arith.constant dense<0.000000e+00> : vector<2x128xf32>
    %36 = tpu.matmul %35, %0, %cst_29 {dimension_numbers = #tpu.dot_dimension_numbers<[1], [0], [0], [1], [0, 0, 1, 1], [], []>} : vector<2x16xf32>, vector<16x128xf32>, vector<2x128xf32> -> vector<2x128xf32>
    %37 = vector.broadcast %1 : vector<1x128xf32> to vector<2x128xf32>
    %38 = arith.addf %36, %37 : vector<2x128xf32>
    %c4_30 = arith.constant 4 : index
    %c0_31 = arith.constant 0 : index
    %c0_32 = arith.constant 0 : index
    %39 = vector.load %arg9[%c4_30, %c0_31, %c0_32] : memref<7x2x128xf32, #tpu.memory_space<vmem>>, vector<1x2x128xf32>
    %40 = vector.shape_cast %39 : vector<1x2x128xf32> to vector<2x128xf32>
    %41 = vector.shape_cast %38 : vector<2x128xf32> to vector<1x2x128xf32>
    tpu.vector_store %arg9[%c4_30, %c0_31, %c0_32], %41 {strides = array<i32>} : memref<7x2x128xf32, #tpu.memory_space<vmem>>, vector<1x2x128xf32>,
    %c5 = arith.constant 5 : index
    %c0_33 = arith.constant 0 : index
    %c0_34 = arith.constant 0 : index
    %42 = vector.load %arg0[%c5, %c0_33, %c0_34] : memref<7x2x16xf32, #tpu.memory_space<vmem>>, vector<1x2x16xf32>
    %43 = vector.shape_cast %42 : vector<1x2x16xf32> to vector<2x16xf32>
    %cst_35 = arith.constant dense<0.000000e+00> : vector<2x128xf32>
    %44 = tpu.matmul %43, %0, %cst_35 {dimension_numbers = #tpu.dot_dimension_numbers<[1], [0], [0], [1], [0, 0, 1, 1], [], []>} : vector<2x16xf32>, vector<16x128xf32>, vector<2x128xf32> -> vector<2x128xf32>
    %45 = vector.broadcast %1 : vector<1x128xf32> to vector<2x128xf32>
    %46 = arith.addf %44, %45 : vector<2x128xf32>
    %c5_36 = arith.constant 5 : index
    %c0_37 = arith.constant 0 : index
    %c0_38 = arith.constant 0 : index
    %47 = vector.load %arg9[%c5_36, %c0_37, %c0_38] : memref<7x2x128xf32, #tpu.memory_space<vmem>>, vector<1x2x128xf32>
    %48 = vector.shape_cast %47 : vector<1x2x128xf32> to vector<2x128xf32>
    %49 = vector.shape_cast %46 : vector<2x128xf32> to vector<1x2x128xf32>
    tpu.vector_store %arg9[%c5_36, %c0_37, %c0_38], %49 {strides = array<i32>} : memref<7x2x128xf32, #tpu.memory_space<vmem>>, vector<1x2x128xf32>,
    %c6 = arith.constant 6 : index
    %c0_39 = arith.constant 0 : index
    %c0_40 = arith.constant 0 : index
    %50 = vector.load %arg0[%c6, %c0_39, %c0_40] : memref<7x2x16xf32, #tpu.memory_space<vmem>>, vector<1x2x16xf32>
    %51 = vector.shape_cast %50 : vector<1x2x16xf32> to vector<2x16xf32>
    %cst_41 = arith.constant dense<0.000000e+00> : vector<2x128xf32>
    %52 = tpu.matmul %51, %0, %cst_41 {dimension_numbers = #tpu.dot_dimension_numbers<[1], [0], [0], [1], [0, 0, 1, 1], [], []>} : vector<2x16xf32>, vector<16x128xf32>, vector<2x128xf32> -> vector<2x128xf32>
    %53 = vector.broadcast %1 : vector<1x128xf32> to vector<2x128xf32>
    %54 = arith.addf %52, %53 : vector<2x128xf32>
    %c6_42 = arith.constant 6 : index
    %c0_43 = arith.constant 0 : index
    %c0_44 = arith.constant 0 : index
    %55 = vector.load %arg9[%c6_42, %c0_43, %c0_44] : memref<7x2x128xf32, #tpu.memory_space<vmem>>, vector<1x2x128xf32>
    %56 = vector.shape_cast %55 : vector<1x2x128xf32> to vector<2x128xf32>
    %57 = vector.shape_cast %54 : vector<2x128xf32> to vector<1x2x128xf32>
    tpu.vector_store %arg9[%c6_42, %c0_43, %c0_44], %57 {strides = array<i32>} : memref<7x2x128xf32, #tpu.memory_space<vmem>>, vector<1x2x128xf32>,
    %c0_45 = arith.constant 0 : index
    %c0_46 = arith.constant 0 : index
    %58 = vector.load %arg2[%c0_45, %c0_46] : memref<32x128xf32, #tpu.memory_space<vmem>>, vector<32x128xf32>
    %c0_47 = arith.constant 0 : index
    %c0_48 = arith.constant 0 : index
    %59 = vector.load %arg4[%c0_47, %c0_48] : memref<2x32xf32, #tpu.memory_space<vmem>>, vector<2x32xf32>
    %c0_49 = arith.constant 0 : index
    %c0_50 = arith.constant 0 : index
    %60 = vector.load %arg5[%c0_49, %c0_50] : memref<2x32xf32, #tpu.memory_space<vmem>>, vector<2x32xf32>
    %c0_i32 = arith.constant 0 : i32
    %61 = arith.index_cast %c0_i32 : i32 to index
    %c0_51 = arith.constant 0 : index
    %c0_52 = arith.constant 0 : index
    %62 = vector.load %arg9[%61, %c0_51, %c0_52] : memref<7x2x128xf32, #tpu.memory_space<vmem>>, vector<1x2x128xf32>
    %63 = vector.shape_cast %62 : vector<1x2x128xf32> to vector<2x128xf32>
    %cst_53 = arith.constant dense<0.000000e+00> : vector<2x128xf32>
    %64 = tpu.matmul %59, %58, %cst_53 {dimension_numbers = #tpu.dot_dimension_numbers<[1], [0], [0], [1], [0, 0, 1, 1], [], []>} : vector<2x32xf32>, vector<32x128xf32>, vector<2x128xf32> -> vector<2x128xf32>
    %65 = arith.addf %63, %64 : vector<2x128xf32>
    %66 = arith.negf %65 : vector<2x128xf32>
    %67 = math.exp %66 : vector<2x128xf32>
    %cst_54 = arith.constant 1.000000e+00 : f32
    %68 = vector.broadcast %cst_54 : f32 to vector<2x128xf32>
    %69 = arith.addf %68, %67 : vector<2x128xf32>
    %70 = arith.divf %68, %69 : vector<2x128xf32>
    %71 = math.tanh %65 : vector<2x128xf32>
    %72 = vector.extract_strided_slice %70 {offsets = [0, 0], sizes = [2, 32], strides = [1, 1]} : vector<2x128xf32> to vector<2x32xf32>
    %73 = vector.extract_strided_slice %70 {offsets = [0, 32], sizes = [2, 32], strides = [1, 1]} : vector<2x128xf32> to vector<2x32xf32>
    %74 = vector.extract_strided_slice %71 {offsets = [0, 64], sizes = [2, 32], strides = [1, 1]} : vector<2x128xf32> to vector<2x32xf32>
    %75 = vector.extract_strided_slice %70 {offsets = [0, 96], sizes = [2, 32], strides = [1, 1]} : vector<2x128xf32> to vector<2x32xf32>
    %76 = arith.mulf %73, %60 : vector<2x32xf32>
    %77 = arith.mulf %72, %74 : vector<2x32xf32>
    %78 = arith.addf %76, %77 : vector<2x32xf32>
    %79 = math.tanh %78 : vector<2x32xf32>
    %80 = arith.mulf %75, %79 : vector<2x32xf32>
    %81 = arith.index_cast %c0_i32 : i32 to index
    %c0_55 = arith.constant 0 : index
    %c0_56 = arith.constant 0 : index
    %82 = vector.load %arg6[%81, %c0_55, %c0_56] : memref<7x2x32xf32, #tpu.memory_space<vmem>>, vector<1x2x32xf32>
    %83 = vector.shape_cast %82 : vector<1x2x32xf32> to vector<2x32xf32>
    %84 = vector.shape_cast %80 : vector<2x32xf32> to vector<1x2x32xf32>
    tpu.vector_store %arg6[%81, %c0_55, %c0_56], %84 {strides = array<i32>} : memref<7x2x32xf32, #tpu.memory_space<vmem>>, vector<1x2x32xf32>,
    %c1_i32 = arith.constant 1 : i32
    %85 = arith.index_cast %c1_i32 : i32 to index
    %c0_57 = arith.constant 0 : index
    %c0_58 = arith.constant 0 : index
    %86 = vector.load %arg9[%85, %c0_57, %c0_58] : memref<7x2x128xf32, #tpu.memory_space<vmem>>, vector<1x2x128xf32>
    %87 = vector.shape_cast %86 : vector<1x2x128xf32> to vector<2x128xf32>
    %cst_59 = arith.constant dense<0.000000e+00> : vector<2x128xf32>
    %88 = tpu.matmul %80, %58, %cst_59 {dimension_numbers = #tpu.dot_dimension_numbers<[1], [0], [0], [1], [0, 0, 1, 1], [], []>} : vector<2x32xf32>, vector<32x128xf32>, vector<2x128xf32> -> vector<2x128xf32>
    %89 = arith.addf %87, %88 : vector<2x128xf32>
    %90 = arith.negf %89 : vector<2x128xf32>
    %91 = math.exp %90 : vector<2x128xf32>
    %cst_60 = arith.constant 1.000000e+00 : f32
    %92 = vector.broadcast %cst_60 : f32 to vector<2x128xf32>
    %93 = arith.addf %92, %91 : vector<2x128xf32>
    %94 = arith.divf %92, %93 : vector<2x128xf32>
    %95 = math.tanh %89 : vector<2x128xf32>
    %96 = vector.extract_strided_slice %94 {offsets = [0, 0], sizes = [2, 32], strides = [1, 1]} : vector<2x128xf32> to vector<2x32xf32>
    %97 = vector.extract_strided_slice %94 {offsets = [0, 32], sizes = [2, 32], strides = [1, 1]} : vector<2x128xf32> to vector<2x32xf32>
    %98 = vector.extract_strided_slice %95 {offsets = [0, 64], sizes = [2, 32], strides = [1, 1]} : vector<2x128xf32> to vector<2x32xf32>
    %99 = vector.extract_strided_slice %94 {offsets = [0, 96], sizes = [2, 32], strides = [1, 1]} : vector<2x128xf32> to vector<2x32xf32>
    %100 = arith.mulf %97, %78 : vector<2x32xf32>
    %101 = arith.mulf %96, %98 : vector<2x32xf32>
    %102 = arith.addf %100, %101 : vector<2x32xf32>
    %103 = math.tanh %102 : vector<2x32xf32>
    %104 = arith.mulf %99, %103 : vector<2x32xf32>
    %105 = arith.index_cast %c1_i32 : i32 to index
    %c0_61 = arith.constant 0 : index
    %c0_62 = arith.constant 0 : index
    %106 = vector.load %arg6[%105, %c0_61, %c0_62] : memref<7x2x32xf32, #tpu.memory_space<vmem>>, vector<1x2x32xf32>
    %107 = vector.shape_cast %106 : vector<1x2x32xf32> to vector<2x32xf32>
    %108 = vector.shape_cast %104 : vector<2x32xf32> to vector<1x2x32xf32>
    tpu.vector_store %arg6[%105, %c0_61, %c0_62], %108 {strides = array<i32>} : memref<7x2x32xf32, #tpu.memory_space<vmem>>, vector<1x2x32xf32>,
    %c2_i32 = arith.constant 2 : i32
    %109 = arith.index_cast %c2_i32 : i32 to index
    %c0_63 = arith.constant 0 : index
    %c0_64 = arith.constant 0 : index
    %110 = vector.load %arg9[%109, %c0_63, %c0_64] : memref<7x2x128xf32, #tpu.memory_space<vmem>>, vector<1x2x128xf32>
    %111 = vector.shape_cast %110 : vector<1x2x128xf32> to vector<2x128xf32>
    %cst_65 = arith.constant dense<0.000000e+00> : vector<2x128xf32>
    %112 = tpu.matmul %104, %58, %cst_65 {dimension_numbers = #tpu.dot_dimension_numbers<[1], [0], [0], [1], [0, 0, 1, 1], [], []>} : vector<2x32xf32>, vector<32x128xf32>, vector<2x128xf32> -> vector<2x128xf32>
    %113 = arith.addf %111, %112 : vector<2x128xf32>
    %114 = arith.negf %113 : vector<2x128xf32>
    %115 = math.exp %114 : vector<2x128xf32>
    %cst_66 = arith.constant 1.000000e+00 : f32
    %116 = vector.broadcast %cst_66 : f32 to vector<2x128xf32>
    %117 = arith.addf %116, %115 : vector<2x128xf32>
    %118 = arith.divf %116, %117 : vector<2x128xf32>
    %119 = math.tanh %113 : vector<2x128xf32>
    %120 = vector.extract_strided_slice %118 {offsets = [0, 0], sizes = [2, 32], strides = [1, 1]} : vector<2x128xf32> to vector<2x32xf32>
    %121 = vector.extract_strided_slice %118 {offsets = [0, 32], sizes = [2, 32], strides = [1, 1]} : vector<2x128xf32> to vector<2x32xf32>
    %122 = vector.extract_strided_slice %119 {offsets = [0, 64], sizes = [2, 32], strides = [1, 1]} : vector<2x128xf32> to vector<2x32xf32>
    %123 = vector.extract_strided_slice %118 {offsets = [0, 96], sizes = [2, 32], strides = [1, 1]} : vector<2x128xf32> to vector<2x32xf32>
    %124 = arith.mulf %121, %102 : vector<2x32xf32>
    %125 = arith.mulf %120, %122 : vector<2x32xf32>
    %126 = arith.addf %124, %125 : vector<2x32xf32>
    %127 = math.tanh %126 : vector<2x32xf32>
    %128 = arith.mulf %123, %127 : vector<2x32xf32>
    %129 = arith.index_cast %c2_i32 : i32 to index
    %c0_67 = arith.constant 0 : index
    %c0_68 = arith.constant 0 : index
    %130 = vector.load %arg6[%129, %c0_67, %c0_68] : memref<7x2x32xf32, #tpu.memory_space<vmem>>, vector<1x2x32xf32>
    %131 = vector.shape_cast %130 : vector<1x2x32xf32> to vector<2x32xf32>
    %132 = vector.shape_cast %128 : vector<2x32xf32> to vector<1x2x32xf32>
    tpu.vector_store %arg6[%129, %c0_67, %c0_68], %132 {strides = array<i32>} : memref<7x2x32xf32, #tpu.memory_space<vmem>>, vector<1x2x32xf32>,
    %c3_i32 = arith.constant 3 : i32
    %133 = arith.index_cast %c3_i32 : i32 to index
    %c0_69 = arith.constant 0 : index
    %c0_70 = arith.constant 0 : index
    %134 = vector.load %arg9[%133, %c0_69, %c0_70] : memref<7x2x128xf32, #tpu.memory_space<vmem>>, vector<1x2x128xf32>
    %135 = vector.shape_cast %134 : vector<1x2x128xf32> to vector<2x128xf32>
    %cst_71 = arith.constant dense<0.000000e+00> : vector<2x128xf32>
    %136 = tpu.matmul %128, %58, %cst_71 {dimension_numbers = #tpu.dot_dimension_numbers<[1], [0], [0], [1], [0, 0, 1, 1], [], []>} : vector<2x32xf32>, vector<32x128xf32>, vector<2x128xf32> -> vector<2x128xf32>
    %137 = arith.addf %135, %136 : vector<2x128xf32>
    %138 = arith.negf %137 : vector<2x128xf32>
    %139 = math.exp %138 : vector<2x128xf32>
    %cst_72 = arith.constant 1.000000e+00 : f32
    %140 = vector.broadcast %cst_72 : f32 to vector<2x128xf32>
    %141 = arith.addf %140, %139 : vector<2x128xf32>
    %142 = arith.divf %140, %141 : vector<2x128xf32>
    %143 = math.tanh %137 : vector<2x128xf32>
    %144 = vector.extract_strided_slice %142 {offsets = [0, 0], sizes = [2, 32], strides = [1, 1]} : vector<2x128xf32> to vector<2x32xf32>
    %145 = vector.extract_strided_slice %142 {offsets = [0, 32], sizes = [2, 32], strides = [1, 1]} : vector<2x128xf32> to vector<2x32xf32>
    %146 = vector.extract_strided_slice %143 {offsets = [0, 64], sizes = [2, 32], strides = [1, 1]} : vector<2x128xf32> to vector<2x32xf32>
    %147 = vector.extract_strided_slice %142 {offsets = [0, 96], sizes = [2, 32], strides = [1, 1]} : vector<2x128xf32> to vector<2x32xf32>
    %148 = arith.mulf %145, %126 : vector<2x32xf32>
    %149 = arith.mulf %144, %146 : vector<2x32xf32>
    %150 = arith.addf %148, %149 : vector<2x32xf32>
    %151 = math.tanh %150 : vector<2x32xf32>
    %152 = arith.mulf %147, %151 : vector<2x32xf32>
    %153 = arith.index_cast %c3_i32 : i32 to index
    %c0_73 = arith.constant 0 : index
    %c0_74 = arith.constant 0 : index
    %154 = vector.load %arg6[%153, %c0_73, %c0_74] : memref<7x2x32xf32, #tpu.memory_space<vmem>>, vector<1x2x32xf32>
    %155 = vector.shape_cast %154 : vector<1x2x32xf32> to vector<2x32xf32>
    %156 = vector.shape_cast %152 : vector<2x32xf32> to vector<1x2x32xf32>
    tpu.vector_store %arg6[%153, %c0_73, %c0_74], %156 {strides = array<i32>} : memref<7x2x32xf32, #tpu.memory_space<vmem>>, vector<1x2x32xf32>,
    %c4_i32 = arith.constant 4 : i32
    %157 = arith.index_cast %c4_i32 : i32 to index
    %c0_75 = arith.constant 0 : index
    %c0_76 = arith.constant 0 : index
    %158 = vector.load %arg9[%157, %c0_75, %c0_76] : memref<7x2x128xf32, #tpu.memory_space<vmem>>, vector<1x2x128xf32>
    %159 = vector.shape_cast %158 : vector<1x2x128xf32> to vector<2x128xf32>
    %cst_77 = arith.constant dense<0.000000e+00> : vector<2x128xf32>
    %160 = tpu.matmul %152, %58, %cst_77 {dimension_numbers = #tpu.dot_dimension_numbers<[1], [0], [0], [1], [0, 0, 1, 1], [], []>} : vector<2x32xf32>, vector<32x128xf32>, vector<2x128xf32> -> vector<2x128xf32>
    %161 = arith.addf %159, %160 : vector<2x128xf32>
    %162 = arith.negf %161 : vector<2x128xf32>
    %163 = math.exp %162 : vector<2x128xf32>
    %cst_78 = arith.constant 1.000000e+00 : f32
    %164 = vector.broadcast %cst_78 : f32 to vector<2x128xf32>
    %165 = arith.addf %164, %163 : vector<2x128xf32>
    %166 = arith.divf %164, %165 : vector<2x128xf32>
    %167 = math.tanh %161 : vector<2x128xf32>
    %168 = vector.extract_strided_slice %166 {offsets = [0, 0], sizes = [2, 32], strides = [1, 1]} : vector<2x128xf32> to vector<2x32xf32>
    %169 = vector.extract_strided_slice %166 {offsets = [0, 32], sizes = [2, 32], strides = [1, 1]} : vector<2x128xf32> to vector<2x32xf32>
    %170 = vector.extract_strided_slice %167 {offsets = [0, 64], sizes = [2, 32], strides = [1, 1]} : vector<2x128xf32> to vector<2x32xf32>
    %171 = vector.extract_strided_slice %166 {offsets = [0, 96], sizes = [2, 32], strides = [1, 1]} : vector<2x128xf32> to vector<2x32xf32>
    %172 = arith.mulf %169, %150 : vector<2x32xf32>
    %173 = arith.mulf %168, %170 : vector<2x32xf32>
    %174 = arith.addf %172, %173 : vector<2x32xf32>
    %175 = math.tanh %174 : vector<2x32xf32>
    %176 = arith.mulf %171, %175 : vector<2x32xf32>
    %177 = arith.index_cast %c4_i32 : i32 to index
    %c0_79 = arith.constant 0 : index
    %c0_80 = arith.constant 0 : index
    %178 = vector.load %arg6[%177, %c0_79, %c0_80] : memref<7x2x32xf32, #tpu.memory_space<vmem>>, vector<1x2x32xf32>
    %179 = vector.shape_cast %178 : vector<1x2x32xf32> to vector<2x32xf32>
    %180 = vector.shape_cast %176 : vector<2x32xf32> to vector<1x2x32xf32>
    tpu.vector_store %arg6[%177, %c0_79, %c0_80], %180 {strides = array<i32>} : memref<7x2x32xf32, #tpu.memory_space<vmem>>, vector<1x2x32xf32>,
    %c5_i32 = arith.constant 5 : i32
    %181 = arith.index_cast %c5_i32 : i32 to index
    %c0_81 = arith.constant 0 : index
    %c0_82 = arith.constant 0 : index
    %182 = vector.load %arg9[%181, %c0_81, %c0_82] : memref<7x2x128xf32, #tpu.memory_space<vmem>>, vector<1x2x128xf32>
    %183 = vector.shape_cast %182 : vector<1x2x128xf32> to vector<2x128xf32>
    %cst_83 = arith.constant dense<0.000000e+00> : vector<2x128xf32>
    %184 = tpu.matmul %176, %58, %cst_83 {dimension_numbers = #tpu.dot_dimension_numbers<[1], [0], [0], [1], [0, 0, 1, 1], [], []>} : vector<2x32xf32>, vector<32x128xf32>, vector<2x128xf32> -> vector<2x128xf32>
    %185 = arith.addf %183, %184 : vector<2x128xf32>
    %186 = arith.negf %185 : vector<2x128xf32>
    %187 = math.exp %186 : vector<2x128xf32>
    %cst_84 = arith.constant 1.000000e+00 : f32
    %188 = vector.broadcast %cst_84 : f32 to vector<2x128xf32>
    %189 = arith.addf %188, %187 : vector<2x128xf32>
    %190 = arith.divf %188, %189 : vector<2x128xf32>
    %191 = math.tanh %185 : vector<2x128xf32>
    %192 = vector.extract_strided_slice %190 {offsets = [0, 0], sizes = [2, 32], strides = [1, 1]} : vector<2x128xf32> to vector<2x32xf32>
    %193 = vector.extract_strided_slice %190 {offsets = [0, 32], sizes = [2, 32], strides = [1, 1]} : vector<2x128xf32> to vector<2x32xf32>
    %194 = vector.extract_strided_slice %191 {offsets = [0, 64], sizes = [2, 32], strides = [1, 1]} : vector<2x128xf32> to vector<2x32xf32>
    %195 = vector.extract_strided_slice %190 {offsets = [0, 96], sizes = [2, 32], strides = [1, 1]} : vector<2x128xf32> to vector<2x32xf32>
    %196 = arith.mulf %193, %174 : vector<2x32xf32>
    %197 = arith.mulf %192, %194 : vector<2x32xf32>
    %198 = arith.addf %196, %197 : vector<2x32xf32>
    %199 = math.tanh %198 : vector<2x32xf32>
    %200 = arith.mulf %195, %199 : vector<2x32xf32>
    %201 = arith.index_cast %c5_i32 : i32 to index
    %c0_85 = arith.constant 0 : index
    %c0_86 = arith.constant 0 : index
    %202 = vector.load %arg6[%201, %c0_85, %c0_86] : memref<7x2x32xf32, #tpu.memory_space<vmem>>, vector<1x2x32xf32>
    %203 = vector.shape_cast %202 : vector<1x2x32xf32> to vector<2x32xf32>
    %204 = vector.shape_cast %200 : vector<2x32xf32> to vector<1x2x32xf32>
    tpu.vector_store %arg6[%201, %c0_85, %c0_86], %204 {strides = array<i32>} : memref<7x2x32xf32, #tpu.memory_space<vmem>>, vector<1x2x32xf32>,
    %c6_i32 = arith.constant 6 : i32
    %205 = arith.index_cast %c6_i32 : i32 to index
    %c0_87 = arith.constant 0 : index
    %c0_88 = arith.constant 0 : index
    %206 = vector.load %arg9[%205, %c0_87, %c0_88] : memref<7x2x128xf32, #tpu.memory_space<vmem>>, vector<1x2x128xf32>
    %207 = vector.shape_cast %206 : vector<1x2x128xf32> to vector<2x128xf32>
    %cst_89 = arith.constant dense<0.000000e+00> : vector<2x128xf32>
    %208 = tpu.matmul %200, %58, %cst_89 {dimension_numbers = #tpu.dot_dimension_numbers<[1], [0], [0], [1], [0, 0, 1, 1], [], []>} : vector<2x32xf32>, vector<32x128xf32>, vector<2x128xf32> -> vector<2x128xf32>
    %209 = arith.addf %207, %208 : vector<2x128xf32>
    %210 = arith.negf %209 : vector<2x128xf32>
    %211 = math.exp %210 : vector<2x128xf32>
    %cst_90 = arith.constant 1.000000e+00 : f32
    %212 = vector.broadcast %cst_90 : f32 to vector<2x128xf32>
    %213 = arith.addf %212, %211 : vector<2x128xf32>
    %214 = arith.divf %212, %213 : vector<2x128xf32>
    %215 = math.tanh %209 : vector<2x128xf32>
    %216 = vector.extract_strided_slice %214 {offsets = [0, 0], sizes = [2, 32], strides = [1, 1]} : vector<2x128xf32> to vector<2x32xf32>
    %217 = vector.extract_strided_slice %214 {offsets = [0, 32], sizes = [2, 32], strides = [1, 1]} : vector<2x128xf32> to vector<2x32xf32>
    %218 = vector.extract_strided_slice %215 {offsets = [0, 64], sizes = [2, 32], strides = [1, 1]} : vector<2x128xf32> to vector<2x32xf32>
    %219 = vector.extract_strided_slice %214 {offsets = [0, 96], sizes = [2, 32], strides = [1, 1]} : vector<2x128xf32> to vector<2x32xf32>
    %220 = arith.mulf %217, %198 : vector<2x32xf32>
    %221 = arith.mulf %216, %218 : vector<2x32xf32>
    %222 = arith.addf %220, %221 : vector<2x32xf32>
    %223 = math.tanh %222 : vector<2x32xf32>
    %224 = arith.mulf %219, %223 : vector<2x32xf32>
    %225 = arith.index_cast %c6_i32 : i32 to index
    %c0_91 = arith.constant 0 : index
    %c0_92 = arith.constant 0 : index
    %226 = vector.load %arg6[%225, %c0_91, %c0_92] : memref<7x2x32xf32, #tpu.memory_space<vmem>>, vector<1x2x32xf32>
    %227 = vector.shape_cast %226 : vector<1x2x32xf32> to vector<2x32xf32>
    %228 = vector.shape_cast %224 : vector<2x32xf32> to vector<1x2x32xf32>
    tpu.vector_store %arg6[%225, %c0_91, %c0_92], %228 {strides = array<i32>} : memref<7x2x32xf32, #tpu.memory_space<vmem>>, vector<1x2x32xf32>,
    %c7_i32 = arith.constant 7 : i32
    %c0_93 = arith.constant 0 : index
    %c0_94 = arith.constant 0 : index
    %229 = vector.load %arg7[%c0_93, %c0_94] : memref<2x32xf32, #tpu.memory_space<vmem>>, vector<2x32xf32>
    tpu.vector_store %arg7[%c0_93, %c0_94], %224 {strides = array<i32>} : memref<2x32xf32, #tpu.memory_space<vmem>>, vector<2x32xf32>,
    %c0_95 = arith.constant 0 : index
    %c0_96 = arith.constant 0 : index
    %230 = vector.load %arg8[%c0_95, %c0_96] : memref<2x32xf32, #tpu.memory_space<vmem>>, vector<2x32xf32>
    tpu.vector_store %arg8[%c0_95, %c0_96], %222 {strides = array<i32>} : memref<2x32xf32, #tpu.memory_space<vmem>>, vector<2x32xf32>,
    return
  }
}

module attributes {stable_mosaic.version = 11 : i64} {
  func.func @_lstm_kernel(%arg0: memref<8x2x16xf32, #tpu.memory_space<vmem>>, %arg1: memref<16x128xf32, #tpu.memory_space<vmem>>, %arg2: memref<32x128xf32, #tpu.memory_space<vmem>>, %arg3: memref<1x128xf32, #tpu.memory_space<vmem>>, %arg4: memref<2x32xf32, #tpu.memory_space<vmem>>, %arg5: memref<2x32xf32, #tpu.memory_space<vmem>>, %arg6: memref<8x2x32xf32, #tpu.memory_space<vmem>>, %arg7: memref<2x32xf32, #tpu.memory_space<vmem>>, %arg8: memref<2x32xf32, #tpu.memory_space<vmem>>, %arg9: memref<8x2x128xf32, #tpu.memory_space<vmem>>) attributes {dimension_semantics = [], scalar_prefetch = 0 : i64, scratch_operands = 1 : i64, tpu.core_type = #tpu.core_type<tc>} {
    %c0 = arith.constant 0 : index
    %c0_0 = arith.constant 0 : index
    %0 = vector.load %arg1[%c0, %c0_0] : memref<16x128xf32, #tpu.memory_space<vmem>>, vector<16x128xf32>
    %c0_1 = arith.constant 0 : index
    %c0_2 = arith.constant 0 : index
    %1 = vector.load %arg3[%c0_1, %c0_2] : memref<1x128xf32, #tpu.memory_space<vmem>>, vector<1x128xf32>
    %c0_3 = arith.constant 0 : index
    %c0_4 = arith.constant 0 : index
    %c0_5 = arith.constant 0 : index
    %2 = vector.load %arg0[%c0_3, %c0_4, %c0_5] : memref<8x2x16xf32, #tpu.memory_space<vmem>>, vector<1x2x16xf32>
    %3 = vector.shape_cast %2 : vector<1x2x16xf32> to vector<2x16xf32>
    %cst = arith.constant dense<0.000000e+00> : vector<2x128xf32>
    %4 = tpu.matmul %3, %0, %cst {dimension_numbers = #tpu.dot_dimension_numbers<[1], [0], [0], [1], [0, 0, 1, 1], [], []>} : vector<2x16xf32>, vector<16x128xf32>, vector<2x128xf32> -> vector<2x128xf32>
    %5 = vector.broadcast %1 : vector<1x128xf32> to vector<2x128xf32>
    %6 = arith.addf %4, %5 : vector<2x128xf32>
    %c0_6 = arith.constant 0 : index
    %c0_7 = arith.constant 0 : index
    %c0_8 = arith.constant 0 : index
    %7 = vector.load %arg9[%c0_6, %c0_7, %c0_8] : memref<8x2x128xf32, #tpu.memory_space<vmem>>, vector<1x2x128xf32>
    %8 = vector.shape_cast %7 : vector<1x2x128xf32> to vector<2x128xf32>
    %9 = vector.shape_cast %6 : vector<2x128xf32> to vector<1x2x128xf32>
    tpu.vector_store %arg9[%c0_6, %c0_7, %c0_8], %9 {strides = array<i32>} : memref<8x2x128xf32, #tpu.memory_space<vmem>>, vector<1x2x128xf32>,
    %c1 = arith.constant 1 : index
    %c0_9 = arith.constant 0 : index
    %c0_10 = arith.constant 0 : index
    %10 = vector.load %arg0[%c1, %c0_9, %c0_10] : memref<8x2x16xf32, #tpu.memory_space<vmem>>, vector<1x2x16xf32>
    %11 = vector.shape_cast %10 : vector<1x2x16xf32> to vector<2x16xf32>
    %cst_11 = arith.constant dense<0.000000e+00> : vector<2x128xf32>
    %12 = tpu.matmul %11, %0, %cst_11 {dimension_numbers = #tpu.dot_dimension_numbers<[1], [0], [0], [1], [0, 0, 1, 1], [], []>} : vector<2x16xf32>, vector<16x128xf32>, vector<2x128xf32> -> vector<2x128xf32>
    %13 = vector.broadcast %1 : vector<1x128xf32> to vector<2x128xf32>
    %14 = arith.addf %12, %13 : vector<2x128xf32>
    %c1_12 = arith.constant 1 : index
    %c0_13 = arith.constant 0 : index
    %c0_14 = arith.constant 0 : index
    %15 = vector.load %arg9[%c1_12, %c0_13, %c0_14] : memref<8x2x128xf32, #tpu.memory_space<vmem>>, vector<1x2x128xf32>
    %16 = vector.shape_cast %15 : vector<1x2x128xf32> to vector<2x128xf32>
    %17 = vector.shape_cast %14 : vector<2x128xf32> to vector<1x2x128xf32>
    tpu.vector_store %arg9[%c1_12, %c0_13, %c0_14], %17 {strides = array<i32>} : memref<8x2x128xf32, #tpu.memory_space<vmem>>, vector<1x2x128xf32>,
    %c2 = arith.constant 2 : index
    %c0_15 = arith.constant 0 : index
    %c0_16 = arith.constant 0 : index
    %18 = vector.load %arg0[%c2, %c0_15, %c0_16] : memref<8x2x16xf32, #tpu.memory_space<vmem>>, vector<1x2x16xf32>
    %19 = vector.shape_cast %18 : vector<1x2x16xf32> to vector<2x16xf32>
    %cst_17 = arith.constant dense<0.000000e+00> : vector<2x128xf32>
    %20 = tpu.matmul %19, %0, %cst_17 {dimension_numbers = #tpu.dot_dimension_numbers<[1], [0], [0], [1], [0, 0, 1, 1], [], []>} : vector<2x16xf32>, vector<16x128xf32>, vector<2x128xf32> -> vector<2x128xf32>
    %21 = vector.broadcast %1 : vector<1x128xf32> to vector<2x128xf32>
    %22 = arith.addf %20, %21 : vector<2x128xf32>
    %c2_18 = arith.constant 2 : index
    %c0_19 = arith.constant 0 : index
    %c0_20 = arith.constant 0 : index
    %23 = vector.load %arg9[%c2_18, %c0_19, %c0_20] : memref<8x2x128xf32, #tpu.memory_space<vmem>>, vector<1x2x128xf32>
    %24 = vector.shape_cast %23 : vector<1x2x128xf32> to vector<2x128xf32>
    %25 = vector.shape_cast %22 : vector<2x128xf32> to vector<1x2x128xf32>
    tpu.vector_store %arg9[%c2_18, %c0_19, %c0_20], %25 {strides = array<i32>} : memref<8x2x128xf32, #tpu.memory_space<vmem>>, vector<1x2x128xf32>,
    %c3 = arith.constant 3 : index
    %c0_21 = arith.constant 0 : index
    %c0_22 = arith.constant 0 : index
    %26 = vector.load %arg0[%c3, %c0_21, %c0_22] : memref<8x2x16xf32, #tpu.memory_space<vmem>>, vector<1x2x16xf32>
    %27 = vector.shape_cast %26 : vector<1x2x16xf32> to vector<2x16xf32>
    %cst_23 = arith.constant dense<0.000000e+00> : vector<2x128xf32>
    %28 = tpu.matmul %27, %0, %cst_23 {dimension_numbers = #tpu.dot_dimension_numbers<[1], [0], [0], [1], [0, 0, 1, 1], [], []>} : vector<2x16xf32>, vector<16x128xf32>, vector<2x128xf32> -> vector<2x128xf32>
    %29 = vector.broadcast %1 : vector<1x128xf32> to vector<2x128xf32>
    %30 = arith.addf %28, %29 : vector<2x128xf32>
    %c3_24 = arith.constant 3 : index
    %c0_25 = arith.constant 0 : index
    %c0_26 = arith.constant 0 : index
    %31 = vector.load %arg9[%c3_24, %c0_25, %c0_26] : memref<8x2x128xf32, #tpu.memory_space<vmem>>, vector<1x2x128xf32>
    %32 = vector.shape_cast %31 : vector<1x2x128xf32> to vector<2x128xf32>
    %33 = vector.shape_cast %30 : vector<2x128xf32> to vector<1x2x128xf32>
    tpu.vector_store %arg9[%c3_24, %c0_25, %c0_26], %33 {strides = array<i32>} : memref<8x2x128xf32, #tpu.memory_space<vmem>>, vector<1x2x128xf32>,
    %c4 = arith.constant 4 : index
    %c0_27 = arith.constant 0 : index
    %c0_28 = arith.constant 0 : index
    %34 = vector.load %arg0[%c4, %c0_27, %c0_28] : memref<8x2x16xf32, #tpu.memory_space<vmem>>, vector<1x2x16xf32>
    %35 = vector.shape_cast %34 : vector<1x2x16xf32> to vector<2x16xf32>
    %cst_29 = arith.constant dense<0.000000e+00> : vector<2x128xf32>
    %36 = tpu.matmul %35, %0, %cst_29 {dimension_numbers = #tpu.dot_dimension_numbers<[1], [0], [0], [1], [0, 0, 1, 1], [], []>} : vector<2x16xf32>, vector<16x128xf32>, vector<2x128xf32> -> vector<2x128xf32>
    %37 = vector.broadcast %1 : vector<1x128xf32> to vector<2x128xf32>
    %38 = arith.addf %36, %37 : vector<2x128xf32>
    %c4_30 = arith.constant 4 : index
    %c0_31 = arith.constant 0 : index
    %c0_32 = arith.constant 0 : index
    %39 = vector.load %arg9[%c4_30, %c0_31, %c0_32] : memref<8x2x128xf32, #tpu.memory_space<vmem>>, vector<1x2x128xf32>
    %40 = vector.shape_cast %39 : vector<1x2x128xf32> to vector<2x128xf32>
    %41 = vector.shape_cast %38 : vector<2x128xf32> to vector<1x2x128xf32>
    tpu.vector_store %arg9[%c4_30, %c0_31, %c0_32], %41 {strides = array<i32>} : memref<8x2x128xf32, #tpu.memory_space<vmem>>, vector<1x2x128xf32>,
    %c5 = arith.constant 5 : index
    %c0_33 = arith.constant 0 : index
    %c0_34 = arith.constant 0 : index
    %42 = vector.load %arg0[%c5, %c0_33, %c0_34] : memref<8x2x16xf32, #tpu.memory_space<vmem>>, vector<1x2x16xf32>
    %43 = vector.shape_cast %42 : vector<1x2x16xf32> to vector<2x16xf32>
    %cst_35 = arith.constant dense<0.000000e+00> : vector<2x128xf32>
    %44 = tpu.matmul %43, %0, %cst_35 {dimension_numbers = #tpu.dot_dimension_numbers<[1], [0], [0], [1], [0, 0, 1, 1], [], []>} : vector<2x16xf32>, vector<16x128xf32>, vector<2x128xf32> -> vector<2x128xf32>
    %45 = vector.broadcast %1 : vector<1x128xf32> to vector<2x128xf32>
    %46 = arith.addf %44, %45 : vector<2x128xf32>
    %c5_36 = arith.constant 5 : index
    %c0_37 = arith.constant 0 : index
    %c0_38 = arith.constant 0 : index
    %47 = vector.load %arg9[%c5_36, %c0_37, %c0_38] : memref<8x2x128xf32, #tpu.memory_space<vmem>>, vector<1x2x128xf32>
    %48 = vector.shape_cast %47 : vector<1x2x128xf32> to vector<2x128xf32>
    %49 = vector.shape_cast %46 : vector<2x128xf32> to vector<1x2x128xf32>
    tpu.vector_store %arg9[%c5_36, %c0_37, %c0_38], %49 {strides = array<i32>} : memref<8x2x128xf32, #tpu.memory_space<vmem>>, vector<1x2x128xf32>,
    %c6 = arith.constant 6 : index
    %c0_39 = arith.constant 0 : index
    %c0_40 = arith.constant 0 : index
    %50 = vector.load %arg0[%c6, %c0_39, %c0_40] : memref<8x2x16xf32, #tpu.memory_space<vmem>>, vector<1x2x16xf32>
    %51 = vector.shape_cast %50 : vector<1x2x16xf32> to vector<2x16xf32>
    %cst_41 = arith.constant dense<0.000000e+00> : vector<2x128xf32>
    %52 = tpu.matmul %51, %0, %cst_41 {dimension_numbers = #tpu.dot_dimension_numbers<[1], [0], [0], [1], [0, 0, 1, 1], [], []>} : vector<2x16xf32>, vector<16x128xf32>, vector<2x128xf32> -> vector<2x128xf32>
    %53 = vector.broadcast %1 : vector<1x128xf32> to vector<2x128xf32>
    %54 = arith.addf %52, %53 : vector<2x128xf32>
    %c6_42 = arith.constant 6 : index
    %c0_43 = arith.constant 0 : index
    %c0_44 = arith.constant 0 : index
    %55 = vector.load %arg9[%c6_42, %c0_43, %c0_44] : memref<8x2x128xf32, #tpu.memory_space<vmem>>, vector<1x2x128xf32>
    %56 = vector.shape_cast %55 : vector<1x2x128xf32> to vector<2x128xf32>
    %57 = vector.shape_cast %54 : vector<2x128xf32> to vector<1x2x128xf32>
    tpu.vector_store %arg9[%c6_42, %c0_43, %c0_44], %57 {strides = array<i32>} : memref<8x2x128xf32, #tpu.memory_space<vmem>>, vector<1x2x128xf32>,
    %c7 = arith.constant 7 : index
    %c0_45 = arith.constant 0 : index
    %c0_46 = arith.constant 0 : index
    %58 = vector.load %arg0[%c7, %c0_45, %c0_46] : memref<8x2x16xf32, #tpu.memory_space<vmem>>, vector<1x2x16xf32>
    %59 = vector.shape_cast %58 : vector<1x2x16xf32> to vector<2x16xf32>
    %cst_47 = arith.constant dense<0.000000e+00> : vector<2x128xf32>
    %60 = tpu.matmul %59, %0, %cst_47 {dimension_numbers = #tpu.dot_dimension_numbers<[1], [0], [0], [1], [0, 0, 1, 1], [], []>} : vector<2x16xf32>, vector<16x128xf32>, vector<2x128xf32> -> vector<2x128xf32>
    %61 = vector.broadcast %1 : vector<1x128xf32> to vector<2x128xf32>
    %62 = arith.addf %60, %61 : vector<2x128xf32>
    %c7_48 = arith.constant 7 : index
    %c0_49 = arith.constant 0 : index
    %c0_50 = arith.constant 0 : index
    %63 = vector.load %arg9[%c7_48, %c0_49, %c0_50] : memref<8x2x128xf32, #tpu.memory_space<vmem>>, vector<1x2x128xf32>
    %64 = vector.shape_cast %63 : vector<1x2x128xf32> to vector<2x128xf32>
    %65 = vector.shape_cast %62 : vector<2x128xf32> to vector<1x2x128xf32>
    tpu.vector_store %arg9[%c7_48, %c0_49, %c0_50], %65 {strides = array<i32>} : memref<8x2x128xf32, #tpu.memory_space<vmem>>, vector<1x2x128xf32>,
    %c0_51 = arith.constant 0 : index
    %c0_52 = arith.constant 0 : index
    %66 = vector.load %arg2[%c0_51, %c0_52] : memref<32x128xf32, #tpu.memory_space<vmem>>, vector<32x128xf32>
    %c0_53 = arith.constant 0 : index
    %c0_54 = arith.constant 0 : index
    %67 = vector.load %arg4[%c0_53, %c0_54] : memref<2x32xf32, #tpu.memory_space<vmem>>, vector<2x32xf32>
    %c0_55 = arith.constant 0 : index
    %c0_56 = arith.constant 0 : index
    %68 = vector.load %arg5[%c0_55, %c0_56] : memref<2x32xf32, #tpu.memory_space<vmem>>, vector<2x32xf32>
    %c0_i32 = arith.constant 0 : i32
    %69 = arith.index_cast %c0_i32 : i32 to index
    %c0_57 = arith.constant 0 : index
    %c0_58 = arith.constant 0 : index
    %70 = vector.load %arg9[%69, %c0_57, %c0_58] : memref<8x2x128xf32, #tpu.memory_space<vmem>>, vector<1x2x128xf32>
    %71 = vector.shape_cast %70 : vector<1x2x128xf32> to vector<2x128xf32>
    %cst_59 = arith.constant dense<0.000000e+00> : vector<2x128xf32>
    %72 = tpu.matmul %67, %66, %cst_59 {dimension_numbers = #tpu.dot_dimension_numbers<[1], [0], [0], [1], [0, 0, 1, 1], [], []>} : vector<2x32xf32>, vector<32x128xf32>, vector<2x128xf32> -> vector<2x128xf32>
    %73 = arith.addf %71, %72 : vector<2x128xf32>
    %74 = arith.negf %73 : vector<2x128xf32>
    %75 = math.exp %74 : vector<2x128xf32>
    %cst_60 = arith.constant 1.000000e+00 : f32
    %76 = vector.broadcast %cst_60 : f32 to vector<2x128xf32>
    %77 = arith.addf %76, %75 : vector<2x128xf32>
    %78 = arith.divf %76, %77 : vector<2x128xf32>
    %79 = math.tanh %73 : vector<2x128xf32>
    %80 = vector.extract_strided_slice %78 {offsets = [0, 0], sizes = [2, 32], strides = [1, 1]} : vector<2x128xf32> to vector<2x32xf32>
    %81 = vector.extract_strided_slice %78 {offsets = [0, 32], sizes = [2, 32], strides = [1, 1]} : vector<2x128xf32> to vector<2x32xf32>
    %82 = vector.extract_strided_slice %79 {offsets = [0, 64], sizes = [2, 32], strides = [1, 1]} : vector<2x128xf32> to vector<2x32xf32>
    %83 = vector.extract_strided_slice %78 {offsets = [0, 96], sizes = [2, 32], strides = [1, 1]} : vector<2x128xf32> to vector<2x32xf32>
    %84 = arith.mulf %81, %68 : vector<2x32xf32>
    %85 = arith.mulf %80, %82 : vector<2x32xf32>
    %86 = arith.addf %84, %85 : vector<2x32xf32>
    %87 = math.tanh %86 : vector<2x32xf32>
    %88 = arith.mulf %83, %87 : vector<2x32xf32>
    %89 = arith.index_cast %c0_i32 : i32 to index
    %c0_61 = arith.constant 0 : index
    %c0_62 = arith.constant 0 : index
    %90 = vector.load %arg6[%89, %c0_61, %c0_62] : memref<8x2x32xf32, #tpu.memory_space<vmem>>, vector<1x2x32xf32>
    %91 = vector.shape_cast %90 : vector<1x2x32xf32> to vector<2x32xf32>
    %92 = vector.shape_cast %88 : vector<2x32xf32> to vector<1x2x32xf32>
    tpu.vector_store %arg6[%89, %c0_61, %c0_62], %92 {strides = array<i32>} : memref<8x2x32xf32, #tpu.memory_space<vmem>>, vector<1x2x32xf32>,
    %c1_i32 = arith.constant 1 : i32
    %93 = arith.index_cast %c1_i32 : i32 to index
    %c0_63 = arith.constant 0 : index
    %c0_64 = arith.constant 0 : index
    %94 = vector.load %arg9[%93, %c0_63, %c0_64] : memref<8x2x128xf32, #tpu.memory_space<vmem>>, vector<1x2x128xf32>
    %95 = vector.shape_cast %94 : vector<1x2x128xf32> to vector<2x128xf32>
    %cst_65 = arith.constant dense<0.000000e+00> : vector<2x128xf32>
    %96 = tpu.matmul %88, %66, %cst_65 {dimension_numbers = #tpu.dot_dimension_numbers<[1], [0], [0], [1], [0, 0, 1, 1], [], []>} : vector<2x32xf32>, vector<32x128xf32>, vector<2x128xf32> -> vector<2x128xf32>
    %97 = arith.addf %95, %96 : vector<2x128xf32>
    %98 = arith.negf %97 : vector<2x128xf32>
    %99 = math.exp %98 : vector<2x128xf32>
    %cst_66 = arith.constant 1.000000e+00 : f32
    %100 = vector.broadcast %cst_66 : f32 to vector<2x128xf32>
    %101 = arith.addf %100, %99 : vector<2x128xf32>
    %102 = arith.divf %100, %101 : vector<2x128xf32>
    %103 = math.tanh %97 : vector<2x128xf32>
    %104 = vector.extract_strided_slice %102 {offsets = [0, 0], sizes = [2, 32], strides = [1, 1]} : vector<2x128xf32> to vector<2x32xf32>
    %105 = vector.extract_strided_slice %102 {offsets = [0, 32], sizes = [2, 32], strides = [1, 1]} : vector<2x128xf32> to vector<2x32xf32>
    %106 = vector.extract_strided_slice %103 {offsets = [0, 64], sizes = [2, 32], strides = [1, 1]} : vector<2x128xf32> to vector<2x32xf32>
    %107 = vector.extract_strided_slice %102 {offsets = [0, 96], sizes = [2, 32], strides = [1, 1]} : vector<2x128xf32> to vector<2x32xf32>
    %108 = arith.mulf %105, %86 : vector<2x32xf32>
    %109 = arith.mulf %104, %106 : vector<2x32xf32>
    %110 = arith.addf %108, %109 : vector<2x32xf32>
    %111 = math.tanh %110 : vector<2x32xf32>
    %112 = arith.mulf %107, %111 : vector<2x32xf32>
    %113 = arith.index_cast %c1_i32 : i32 to index
    %c0_67 = arith.constant 0 : index
    %c0_68 = arith.constant 0 : index
    %114 = vector.load %arg6[%113, %c0_67, %c0_68] : memref<8x2x32xf32, #tpu.memory_space<vmem>>, vector<1x2x32xf32>
    %115 = vector.shape_cast %114 : vector<1x2x32xf32> to vector<2x32xf32>
    %116 = vector.shape_cast %112 : vector<2x32xf32> to vector<1x2x32xf32>
    tpu.vector_store %arg6[%113, %c0_67, %c0_68], %116 {strides = array<i32>} : memref<8x2x32xf32, #tpu.memory_space<vmem>>, vector<1x2x32xf32>,
    %c2_i32 = arith.constant 2 : i32
    %117 = arith.index_cast %c2_i32 : i32 to index
    %c0_69 = arith.constant 0 : index
    %c0_70 = arith.constant 0 : index
    %118 = vector.load %arg9[%117, %c0_69, %c0_70] : memref<8x2x128xf32, #tpu.memory_space<vmem>>, vector<1x2x128xf32>
    %119 = vector.shape_cast %118 : vector<1x2x128xf32> to vector<2x128xf32>
    %cst_71 = arith.constant dense<0.000000e+00> : vector<2x128xf32>
    %120 = tpu.matmul %112, %66, %cst_71 {dimension_numbers = #tpu.dot_dimension_numbers<[1], [0], [0], [1], [0, 0, 1, 1], [], []>} : vector<2x32xf32>, vector<32x128xf32>, vector<2x128xf32> -> vector<2x128xf32>
    %121 = arith.addf %119, %120 : vector<2x128xf32>
    %122 = arith.negf %121 : vector<2x128xf32>
    %123 = math.exp %122 : vector<2x128xf32>
    %cst_72 = arith.constant 1.000000e+00 : f32
    %124 = vector.broadcast %cst_72 : f32 to vector<2x128xf32>
    %125 = arith.addf %124, %123 : vector<2x128xf32>
    %126 = arith.divf %124, %125 : vector<2x128xf32>
    %127 = math.tanh %121 : vector<2x128xf32>
    %128 = vector.extract_strided_slice %126 {offsets = [0, 0], sizes = [2, 32], strides = [1, 1]} : vector<2x128xf32> to vector<2x32xf32>
    %129 = vector.extract_strided_slice %126 {offsets = [0, 32], sizes = [2, 32], strides = [1, 1]} : vector<2x128xf32> to vector<2x32xf32>
    %130 = vector.extract_strided_slice %127 {offsets = [0, 64], sizes = [2, 32], strides = [1, 1]} : vector<2x128xf32> to vector<2x32xf32>
    %131 = vector.extract_strided_slice %126 {offsets = [0, 96], sizes = [2, 32], strides = [1, 1]} : vector<2x128xf32> to vector<2x32xf32>
    %132 = arith.mulf %129, %110 : vector<2x32xf32>
    %133 = arith.mulf %128, %130 : vector<2x32xf32>
    %134 = arith.addf %132, %133 : vector<2x32xf32>
    %135 = math.tanh %134 : vector<2x32xf32>
    %136 = arith.mulf %131, %135 : vector<2x32xf32>
    %137 = arith.index_cast %c2_i32 : i32 to index
    %c0_73 = arith.constant 0 : index
    %c0_74 = arith.constant 0 : index
    %138 = vector.load %arg6[%137, %c0_73, %c0_74] : memref<8x2x32xf32, #tpu.memory_space<vmem>>, vector<1x2x32xf32>
    %139 = vector.shape_cast %138 : vector<1x2x32xf32> to vector<2x32xf32>
    %140 = vector.shape_cast %136 : vector<2x32xf32> to vector<1x2x32xf32>
    tpu.vector_store %arg6[%137, %c0_73, %c0_74], %140 {strides = array<i32>} : memref<8x2x32xf32, #tpu.memory_space<vmem>>, vector<1x2x32xf32>,
    %c3_i32 = arith.constant 3 : i32
    %141 = arith.index_cast %c3_i32 : i32 to index
    %c0_75 = arith.constant 0 : index
    %c0_76 = arith.constant 0 : index
    %142 = vector.load %arg9[%141, %c0_75, %c0_76] : memref<8x2x128xf32, #tpu.memory_space<vmem>>, vector<1x2x128xf32>
    %143 = vector.shape_cast %142 : vector<1x2x128xf32> to vector<2x128xf32>
    %cst_77 = arith.constant dense<0.000000e+00> : vector<2x128xf32>
    %144 = tpu.matmul %136, %66, %cst_77 {dimension_numbers = #tpu.dot_dimension_numbers<[1], [0], [0], [1], [0, 0, 1, 1], [], []>} : vector<2x32xf32>, vector<32x128xf32>, vector<2x128xf32> -> vector<2x128xf32>
    %145 = arith.addf %143, %144 : vector<2x128xf32>
    %146 = arith.negf %145 : vector<2x128xf32>
    %147 = math.exp %146 : vector<2x128xf32>
    %cst_78 = arith.constant 1.000000e+00 : f32
    %148 = vector.broadcast %cst_78 : f32 to vector<2x128xf32>
    %149 = arith.addf %148, %147 : vector<2x128xf32>
    %150 = arith.divf %148, %149 : vector<2x128xf32>
    %151 = math.tanh %145 : vector<2x128xf32>
    %152 = vector.extract_strided_slice %150 {offsets = [0, 0], sizes = [2, 32], strides = [1, 1]} : vector<2x128xf32> to vector<2x32xf32>
    %153 = vector.extract_strided_slice %150 {offsets = [0, 32], sizes = [2, 32], strides = [1, 1]} : vector<2x128xf32> to vector<2x32xf32>
    %154 = vector.extract_strided_slice %151 {offsets = [0, 64], sizes = [2, 32], strides = [1, 1]} : vector<2x128xf32> to vector<2x32xf32>
    %155 = vector.extract_strided_slice %150 {offsets = [0, 96], sizes = [2, 32], strides = [1, 1]} : vector<2x128xf32> to vector<2x32xf32>
    %156 = arith.mulf %153, %134 : vector<2x32xf32>
    %157 = arith.mulf %152, %154 : vector<2x32xf32>
    %158 = arith.addf %156, %157 : vector<2x32xf32>
    %159 = math.tanh %158 : vector<2x32xf32>
    %160 = arith.mulf %155, %159 : vector<2x32xf32>
    %161 = arith.index_cast %c3_i32 : i32 to index
    %c0_79 = arith.constant 0 : index
    %c0_80 = arith.constant 0 : index
    %162 = vector.load %arg6[%161, %c0_79, %c0_80] : memref<8x2x32xf32, #tpu.memory_space<vmem>>, vector<1x2x32xf32>
    %163 = vector.shape_cast %162 : vector<1x2x32xf32> to vector<2x32xf32>
    %164 = vector.shape_cast %160 : vector<2x32xf32> to vector<1x2x32xf32>
    tpu.vector_store %arg6[%161, %c0_79, %c0_80], %164 {strides = array<i32>} : memref<8x2x32xf32, #tpu.memory_space<vmem>>, vector<1x2x32xf32>,
    %c4_i32 = arith.constant 4 : i32
    %165 = arith.index_cast %c4_i32 : i32 to index
    %c0_81 = arith.constant 0 : index
    %c0_82 = arith.constant 0 : index
    %166 = vector.load %arg9[%165, %c0_81, %c0_82] : memref<8x2x128xf32, #tpu.memory_space<vmem>>, vector<1x2x128xf32>
    %167 = vector.shape_cast %166 : vector<1x2x128xf32> to vector<2x128xf32>
    %cst_83 = arith.constant dense<0.000000e+00> : vector<2x128xf32>
    %168 = tpu.matmul %160, %66, %cst_83 {dimension_numbers = #tpu.dot_dimension_numbers<[1], [0], [0], [1], [0, 0, 1, 1], [], []>} : vector<2x32xf32>, vector<32x128xf32>, vector<2x128xf32> -> vector<2x128xf32>
    %169 = arith.addf %167, %168 : vector<2x128xf32>
    %170 = arith.negf %169 : vector<2x128xf32>
    %171 = math.exp %170 : vector<2x128xf32>
    %cst_84 = arith.constant 1.000000e+00 : f32
    %172 = vector.broadcast %cst_84 : f32 to vector<2x128xf32>
    %173 = arith.addf %172, %171 : vector<2x128xf32>
    %174 = arith.divf %172, %173 : vector<2x128xf32>
    %175 = math.tanh %169 : vector<2x128xf32>
    %176 = vector.extract_strided_slice %174 {offsets = [0, 0], sizes = [2, 32], strides = [1, 1]} : vector<2x128xf32> to vector<2x32xf32>
    %177 = vector.extract_strided_slice %174 {offsets = [0, 32], sizes = [2, 32], strides = [1, 1]} : vector<2x128xf32> to vector<2x32xf32>
    %178 = vector.extract_strided_slice %175 {offsets = [0, 64], sizes = [2, 32], strides = [1, 1]} : vector<2x128xf32> to vector<2x32xf32>
    %179 = vector.extract_strided_slice %174 {offsets = [0, 96], sizes = [2, 32], strides = [1, 1]} : vector<2x128xf32> to vector<2x32xf32>
    %180 = arith.mulf %177, %158 : vector<2x32xf32>
    %181 = arith.mulf %176, %178 : vector<2x32xf32>
    %182 = arith.addf %180, %181 : vector<2x32xf32>
    %183 = math.tanh %182 : vector<2x32xf32>
    %184 = arith.mulf %179, %183 : vector<2x32xf32>
    %185 = arith.index_cast %c4_i32 : i32 to index
    %c0_85 = arith.constant 0 : index
    %c0_86 = arith.constant 0 : index
    %186 = vector.load %arg6[%185, %c0_85, %c0_86] : memref<8x2x32xf32, #tpu.memory_space<vmem>>, vector<1x2x32xf32>
    %187 = vector.shape_cast %186 : vector<1x2x32xf32> to vector<2x32xf32>
    %188 = vector.shape_cast %184 : vector<2x32xf32> to vector<1x2x32xf32>
    tpu.vector_store %arg6[%185, %c0_85, %c0_86], %188 {strides = array<i32>} : memref<8x2x32xf32, #tpu.memory_space<vmem>>, vector<1x2x32xf32>,
    %c5_i32 = arith.constant 5 : i32
    %189 = arith.index_cast %c5_i32 : i32 to index
    %c0_87 = arith.constant 0 : index
    %c0_88 = arith.constant 0 : index
    %190 = vector.load %arg9[%189, %c0_87, %c0_88] : memref<8x2x128xf32, #tpu.memory_space<vmem>>, vector<1x2x128xf32>
    %191 = vector.shape_cast %190 : vector<1x2x128xf32> to vector<2x128xf32>
    %cst_89 = arith.constant dense<0.000000e+00> : vector<2x128xf32>
    %192 = tpu.matmul %184, %66, %cst_89 {dimension_numbers = #tpu.dot_dimension_numbers<[1], [0], [0], [1], [0, 0, 1, 1], [], []>} : vector<2x32xf32>, vector<32x128xf32>, vector<2x128xf32> -> vector<2x128xf32>
    %193 = arith.addf %191, %192 : vector<2x128xf32>
    %194 = arith.negf %193 : vector<2x128xf32>
    %195 = math.exp %194 : vector<2x128xf32>
    %cst_90 = arith.constant 1.000000e+00 : f32
    %196 = vector.broadcast %cst_90 : f32 to vector<2x128xf32>
    %197 = arith.addf %196, %195 : vector<2x128xf32>
    %198 = arith.divf %196, %197 : vector<2x128xf32>
    %199 = math.tanh %193 : vector<2x128xf32>
    %200 = vector.extract_strided_slice %198 {offsets = [0, 0], sizes = [2, 32], strides = [1, 1]} : vector<2x128xf32> to vector<2x32xf32>
    %201 = vector.extract_strided_slice %198 {offsets = [0, 32], sizes = [2, 32], strides = [1, 1]} : vector<2x128xf32> to vector<2x32xf32>
    %202 = vector.extract_strided_slice %199 {offsets = [0, 64], sizes = [2, 32], strides = [1, 1]} : vector<2x128xf32> to vector<2x32xf32>
    %203 = vector.extract_strided_slice %198 {offsets = [0, 96], sizes = [2, 32], strides = [1, 1]} : vector<2x128xf32> to vector<2x32xf32>
    %204 = arith.mulf %201, %182 : vector<2x32xf32>
    %205 = arith.mulf %200, %202 : vector<2x32xf32>
    %206 = arith.addf %204, %205 : vector<2x32xf32>
    %207 = math.tanh %206 : vector<2x32xf32>
    %208 = arith.mulf %203, %207 : vector<2x32xf32>
    %209 = arith.index_cast %c5_i32 : i32 to index
    %c0_91 = arith.constant 0 : index
    %c0_92 = arith.constant 0 : index
    %210 = vector.load %arg6[%209, %c0_91, %c0_92] : memref<8x2x32xf32, #tpu.memory_space<vmem>>, vector<1x2x32xf32>
    %211 = vector.shape_cast %210 : vector<1x2x32xf32> to vector<2x32xf32>
    %212 = vector.shape_cast %208 : vector<2x32xf32> to vector<1x2x32xf32>
    tpu.vector_store %arg6[%209, %c0_91, %c0_92], %212 {strides = array<i32>} : memref<8x2x32xf32, #tpu.memory_space<vmem>>, vector<1x2x32xf32>,
    %c6_i32 = arith.constant 6 : i32
    %213 = arith.index_cast %c6_i32 : i32 to index
    %c0_93 = arith.constant 0 : index
    %c0_94 = arith.constant 0 : index
    %214 = vector.load %arg9[%213, %c0_93, %c0_94] : memref<8x2x128xf32, #tpu.memory_space<vmem>>, vector<1x2x128xf32>
    %215 = vector.shape_cast %214 : vector<1x2x128xf32> to vector<2x128xf32>
    %cst_95 = arith.constant dense<0.000000e+00> : vector<2x128xf32>
    %216 = tpu.matmul %208, %66, %cst_95 {dimension_numbers = #tpu.dot_dimension_numbers<[1], [0], [0], [1], [0, 0, 1, 1], [], []>} : vector<2x32xf32>, vector<32x128xf32>, vector<2x128xf32> -> vector<2x128xf32>
    %217 = arith.addf %215, %216 : vector<2x128xf32>
    %218 = arith.negf %217 : vector<2x128xf32>
    %219 = math.exp %218 : vector<2x128xf32>
    %cst_96 = arith.constant 1.000000e+00 : f32
    %220 = vector.broadcast %cst_96 : f32 to vector<2x128xf32>
    %221 = arith.addf %220, %219 : vector<2x128xf32>
    %222 = arith.divf %220, %221 : vector<2x128xf32>
    %223 = math.tanh %217 : vector<2x128xf32>
    %224 = vector.extract_strided_slice %222 {offsets = [0, 0], sizes = [2, 32], strides = [1, 1]} : vector<2x128xf32> to vector<2x32xf32>
    %225 = vector.extract_strided_slice %222 {offsets = [0, 32], sizes = [2, 32], strides = [1, 1]} : vector<2x128xf32> to vector<2x32xf32>
    %226 = vector.extract_strided_slice %223 {offsets = [0, 64], sizes = [2, 32], strides = [1, 1]} : vector<2x128xf32> to vector<2x32xf32>
    %227 = vector.extract_strided_slice %222 {offsets = [0, 96], sizes = [2, 32], strides = [1, 1]} : vector<2x128xf32> to vector<2x32xf32>
    %228 = arith.mulf %225, %206 : vector<2x32xf32>
    %229 = arith.mulf %224, %226 : vector<2x32xf32>
    %230 = arith.addf %228, %229 : vector<2x32xf32>
    %231 = math.tanh %230 : vector<2x32xf32>
    %232 = arith.mulf %227, %231 : vector<2x32xf32>
    %233 = arith.index_cast %c6_i32 : i32 to index
    %c0_97 = arith.constant 0 : index
    %c0_98 = arith.constant 0 : index
    %234 = vector.load %arg6[%233, %c0_97, %c0_98] : memref<8x2x32xf32, #tpu.memory_space<vmem>>, vector<1x2x32xf32>
    %235 = vector.shape_cast %234 : vector<1x2x32xf32> to vector<2x32xf32>
    %236 = vector.shape_cast %232 : vector<2x32xf32> to vector<1x2x32xf32>
    tpu.vector_store %arg6[%233, %c0_97, %c0_98], %236 {strides = array<i32>} : memref<8x2x32xf32, #tpu.memory_space<vmem>>, vector<1x2x32xf32>,
    %c7_i32 = arith.constant 7 : i32
    %237 = arith.index_cast %c7_i32 : i32 to index
    %c0_99 = arith.constant 0 : index
    %c0_100 = arith.constant 0 : index
    %238 = vector.load %arg9[%237, %c0_99, %c0_100] : memref<8x2x128xf32, #tpu.memory_space<vmem>>, vector<1x2x128xf32>
    %239 = vector.shape_cast %238 : vector<1x2x128xf32> to vector<2x128xf32>
    %cst_101 = arith.constant dense<0.000000e+00> : vector<2x128xf32>
    %240 = tpu.matmul %232, %66, %cst_101 {dimension_numbers = #tpu.dot_dimension_numbers<[1], [0], [0], [1], [0, 0, 1, 1], [], []>} : vector<2x32xf32>, vector<32x128xf32>, vector<2x128xf32> -> vector<2x128xf32>
    %241 = arith.addf %239, %240 : vector<2x128xf32>
    %242 = arith.negf %241 : vector<2x128xf32>
    %243 = math.exp %242 : vector<2x128xf32>
    %cst_102 = arith.constant 1.000000e+00 : f32
    %244 = vector.broadcast %cst_102 : f32 to vector<2x128xf32>
    %245 = arith.addf %244, %243 : vector<2x128xf32>
    %246 = arith.divf %244, %245 : vector<2x128xf32>
    %247 = math.tanh %241 : vector<2x128xf32>
    %248 = vector.extract_strided_slice %246 {offsets = [0, 0], sizes = [2, 32], strides = [1, 1]} : vector<2x128xf32> to vector<2x32xf32>
    %249 = vector.extract_strided_slice %246 {offsets = [0, 32], sizes = [2, 32], strides = [1, 1]} : vector<2x128xf32> to vector<2x32xf32>
    %250 = vector.extract_strided_slice %247 {offsets = [0, 64], sizes = [2, 32], strides = [1, 1]} : vector<2x128xf32> to vector<2x32xf32>
    %251 = vector.extract_strided_slice %246 {offsets = [0, 96], sizes = [2, 32], strides = [1, 1]} : vector<2x128xf32> to vector<2x32xf32>
    %252 = arith.mulf %249, %230 : vector<2x32xf32>
    %253 = arith.mulf %248, %250 : vector<2x32xf32>
    %254 = arith.addf %252, %253 : vector<2x32xf32>
    %255 = math.tanh %254 : vector<2x32xf32>
    %256 = arith.mulf %251, %255 : vector<2x32xf32>
    %257 = arith.index_cast %c7_i32 : i32 to index
    %c0_103 = arith.constant 0 : index
    %c0_104 = arith.constant 0 : index
    %258 = vector.load %arg6[%257, %c0_103, %c0_104] : memref<8x2x32xf32, #tpu.memory_space<vmem>>, vector<1x2x32xf32>
    %259 = vector.shape_cast %258 : vector<1x2x32xf32> to vector<2x32xf32>
    %260 = vector.shape_cast %256 : vector<2x32xf32> to vector<1x2x32xf32>
    tpu.vector_store %arg6[%257, %c0_103, %c0_104], %260 {strides = array<i32>} : memref<8x2x32xf32, #tpu.memory_space<vmem>>, vector<1x2x32xf32>,
    %c8_i32 = arith.constant 8 : i32
    %c0_105 = arith.constant 0 : index
    %c0_106 = arith.constant 0 : index
    %261 = vector.load %arg7[%c0_105, %c0_106] : memref<2x32xf32, #tpu.memory_space<vmem>>, vector<2x32xf32>
    tpu.vector_store %arg7[%c0_105, %c0_106], %256 {strides = array<i32>} : memref<2x32xf32, #tpu.memory_space<vmem>>, vector<2x32xf32>,
    %c0_107 = arith.constant 0 : index
    %c0_108 = arith.constant 0 : index
    %262 = vector.load %arg8[%c0_107, %c0_108] : memref<2x32xf32, #tpu.memory_space<vmem>>, vector<2x32xf32>
    tpu.vector_store %arg8[%c0_107, %c0_108], %254 {strides = array<i32>} : memref<2x32xf32, #tpu.memory_space<vmem>>, vector<2x32xf32>,
    return
  }
}

</mosaic_0001>

<bundles_post_ra>
// kernel: seq2seq_forward.5
= control target key start
LH: loop header
LB: loop body
LE: loop exit
PB: predicated region body
PF: predicated region fallthrough
CT: control target
= control target key end

     0   :  { %v185_v3 = vmov 0   ;;  %s251_s0 = inlined_call_operand.vmem [shape: f32[14,32], index: 0, kind: input, shape index: {}]   ;;  %s252_s1 = inlined_call_operand.vmem [shape: f32[32,32], index: 1, kind: input, shape index: {}]   ;;  %s253_s2 = inlined_call_operand.vmem [shape: f32[1,32], index: 2, kind: input, shape index: {}]   ;;  %s254_s3 = inlined_call_operand.vmem [shape: s32[14,1], index: 3, kind: input, shape index: {}]   ;;  %s255_s4 = inlined_call_operand.hbm [shape: f32[1,1], index: 4, kind: output, shape index: {}]  }
   0x1   :  { %v23_v0 = vld [vmem:[%s252_s1 + $0x18] sm:$0xff]  ;;  %v22_v1 = vld [vmem:[%s252_s1 + $0x10] sm:$0xff]  ;;  %v21_v2 = vld [vmem:[%s252_s1 + $0x8] sm:$0xff]  ;;  %148 = vset.pattern.permute.xlu1 %v185_v3  ;;  %149 = vset.pattern.permute.xlu0 %v185_v3 }
   0x2   :  { %141 = vmatpush.msra.mxu1 %v23_v0  ;;  %47 = vmatpush.msra.mxu0 %v23_v0  ;;  %v86_v4 = vld [vmem:[%s254_s3 + $0x8] sm:$0x3f] }
   0x4   :  { %142 = vmatpush.msra.mxu1 %v22_v1  ;;  %48 = vmatpush.msra.mxu0 %v22_v1 }
   0x5   :  { %9 = vsyncpa [#allocation3], 0  ;;  %v20_v5 = vld [vmem:[%s252_s1] sm:$0xff]  ;;  %91 = vperm.xlu1 %148, %v86_v4   ;;  %v19_v6 = vld [vmem:[%s251_s0 + $0x8] sm:$0x3f]  ;;  %vm28_vm0 = vcmask 261120   ;;  %v83_v10 = vlaneseq }
   0x6   :  { %143 = vmatpush.msra.mxu1 %v21_v2  ;;  %49 = vmatpush.msra.mxu0 %v21_v2  ;;  %v18_v7 = vld [vmem:[%s251_s0] sm:$0xff]  ;;  %vm61_vm2 = vcmask 259072   ;;  %v186_v15 = vmov 0.0   ;;  %vm109_vm4 = vcmask 1045504   ;;  %s187_s0 = smov [#allocation2]   ;;  %s128_s7 = sshll.u32 %s255_s4, 4  ;;  %s129_s7 = int_to_ptr.hbm [resolvable:$true] %s128_s7 }
   0x7   :  { %v85_v8 = vld [vmem:[%s254_s3] sm:$0xff]  ;;  %v84_v12 = vand.u32 127, %v83_v10  ;;  %vm119_vm5 = vcmask 0  }
   0x8   :  { %144 = vmatpush.msra.mxu1 %v20_v5  ;;  %50 = vmatpush.msra.mxu0 %v20_v5  ;;  %v150_v13 = vld [vmem:[%s253_s2] ss:$0 sm:$0xff]  ;;  %s126_s2 = sshll.u32 %s187_s0, 4  ;;  %s127_s2 = int_to_ptr.vmem [resolvable:$true] %s126_s2 }
   0x9   :  { %138 = vmatmul.msk.f32.vlgmr.msra.gmra.mxu1 %vm28_vm0, %v19_v6  ;;  %137 = vmatmul.msk.f32.vlgmr.msra.gmra.mxu0 %vm28_vm0, %v18_v7 }
   0xd   :  { %88 = vperm.xlu1 %148, %v85_v8  }
  0x77   :  { %v92_v9 = vpop.permute.xlu1 %91 }
  0x78   :  { %vm94_vm3 = vcmp.eq.s32.totalorder %v84_v12, %v92_v9 }
  0x79   :  { %v140_v24 = vsel %vm94_vm3, 1.0, %v186_v15 }
  0x7f   :  { %v89_v11 = vpop.permute.xlu1 %88 }
  0x80   :  { %vm93_vm1 = vcmp.eq.s32.totalorder %v84_v12, %v89_v11 }
  0x81   :  { %v139_v16 = vsel %vm93_vm1, 1.0, %v186_v15 }
  0x86   :  { %v55_v14 = vpop.f32.mrf.mxu1  ;;  %v52_v17 = vpop.f32.mrf.mxu0 }
  0x87   :  { %v56_v18 = vadd.f32 %v150_v13, %v55_v14  ;;  %v53_v19 = vadd.f32 %v150_v13, %v52_v17 }
  0x89   :  { %v62_v20 = vsel %vm61_vm2, %v56_v18, -inf  ;;  %v99_v21 = vmul.f32 %v139_v16, %v53_v19  ;;  %v58_v23 = vsel %vm28_vm0, %v53_v19, -inf  ;;  %v100_v25 = vmul.f32 %v140_v24, %v56_v18 }
  0x8a   :  { %63 = vmax.xlane.f32.xlu0 %v62_v20 }
  0x8b   :  { %v101_v22 = vsel %vm28_vm0, %v99_v21, 0.0  ;;  %v104_v26 = vsel %vm61_vm2, %v100_v25, 0.0 }
  0x8c   :  { %102 = vadd.xlane.f32.xlu1 %v101_v22 }
  0x92   :  { %59 = vmax.xlane.f32.xlu0 %v58_v23 }
  0x9a   :  { %105 = vadd.xlane.f32.xlu0 %v104_v26 }
  0xfd   :  { %v64_v27 = vpop.xlane.xlu0 %63 }
  0xfe   :  { %v66_v28 = vsub.f32 %v56_v18, %v64_v27 }
  0xff   :  { %v103_v47 = vpop.xlane.xlu1 %102 }
 0x100   :  { %v69_v29 = vmul.f32 1.442695, %v66_v28 }
 0x102   :  { %151 = vpow2.f32 %v69_v29 }
 0x105   :  { %v60_v30 = vpop.xlane.xlu0 %59 }
 0x106   :  { %v65_v31 = vsub.f32 %v53_v19, %v60_v30 }
 0x108   :  { %v152_v32 = vpop.eup %151  ;;  %v67_v33 = vmul.f32 1.442695, %v65_v31 }
 0x109   :  { %v74_v34 = vsel %vm61_vm2, %v152_v32, 0.0 }
 0x10a   :  { %153 = vpow2.f32 %v67_v33  ;;  %75 = vadd.xlane.f32.xlu2 %v74_v34 }
 0x10d   :  { %v106_v43 = vpop.xlane.xlu0 %105 }
 0x110   :  { %v154_v35 = vpop.eup %153 }
 0x111   :  { %v71_v36 = vsel %vm28_vm0, %v154_v35, 0.0 }
 0x112   :  { %72 = vadd.xlane.f32.xlu2 %v71_v36 }
 0x17d   :  { %v76_v37 = vpop.xlane.xlu2 %75 }
 0x17e   :  { %155 = vlog2.f32 %v76_v37 }
 0x184   :  { %v156_v38 = vpop.eup %155 }
 0x185   :  { %v73_v39 = vpop.xlane.xlu2 %72  ;;  %v80_v40 = vmul.f32 0.6931472, %v156_v38 }
 0x186   :  { %157 = vlog2.f32 %v73_v39 }
 0x187   :  { %v82_v41 = vadd.f32 %v80_v40, %v64_v27 }
 0x189   :  { %v108_v45 = vsub.f32 %v82_v41, %v106_v43 }
 0x18b   :  { %v110_v49 = vsel %vm109_vm4, %v108_v45, 0.0 }
 0x18c   :  { %v158_v42 = vpop.eup %157 }
 0x18d   :  { %v78_v44 = vmul.f32 0.6931472, %v158_v42 }
 0x18f   :  { %v81_v46 = vadd.f32 %v78_v44, %v60_v30 }
 0x191   :  { %v107_v48 = vsub.f32 %v81_v46, %v103_v47 }
 0x193   :  { %v111_v50 = vadd.f32 %v110_v49, %v107_v48 }
 0x195   :  { %v112_v51 = vrot.slane %v111_v50, 4 }
 0x197   :  { %v113_v52 = vadd.f32 %v112_v51, %v111_v50 }
 0x199   :  { %v114_v53 = vrot.slane %v113_v52, 2 }
 0x19b   :  { %v115_v54 = vadd.f32 %v114_v53, %v113_v52 }
 0x19d   :  { %v116_v55 = vrot.slane %v115_v54, 1 }
 0x19f   :  { %v117_v56 = vadd.f32 %v116_v55, %v115_v54 }
 0x1a1   :  { %v118_v57 = vmul.f32 0.071428575, %v117_v56 }
 0x1a3   :  { %120 = vst.msk [vmem:[#allocation2] sm:$0x1] %vm119_vm5, %v118_v57 }
 0x1a4   :  { %131 = dma.vmem_to_hbm [thread:$0]  %s127_s2, 16, %s129_s7, [#allocation3]  }
 0x1a5   :  { %183 = dma.done.wait [#allocation3], 16  }
 0x1a6   :  { %184 = vsyncadd [#allocation3], 4294967280 }
 0x1a7   :  { %136 = vsyncpa [#allocation3], 1 }

// kernel: seq2seq_forward.4
= control target key start
LH: loop header
LB: loop body
LE: loop exit
PB: predicated region body
PF: predicated region fallthrough
CT: control target
= control target key end

     0   :  { %14 = vsyncpa [#allocation4], 0  ;;  %vm35_vm0 = vcmask 130048   ;;  %s1114_s0 = inlined_call_operand.vmem [shape: f32[7,2,16], index: 0, kind: input, shape index: {}]   ;;  %s1115_s1 = inlined_call_operand.vmem [shape: f32[16,128], index: 1, kind: input, shape index: {}]   ;;  %s1116_s2 = inlined_call_operand.vmem [shape: f32[32,128], index: 2, kind: input, shape index: {}]   ;;  %s1117_s3 = inlined_call_operand.vmem [shape: f32[1,128], index: 3, kind: input, shape index: {}]   ;;  %s1118_s4 = inlined_call_operand.vmem [shape: f32[2,32], index: 4, kind: input, shape index: {}]   ;;  %s1119_s5 = inlined_call_operand.vmem [shape: f32[2,32], index: 5, kind: input, shape index: {}]   ;;  %s1120_s6 = inlined_call_operand.vmem [shape: f32[7,2,32], index: 6, kind: output, shape index: {0}]   ;;  %s1121_s7 = inlined_call_operand.hbm [shape: f32[2,32], index: 7, kind: output, shape index: {1}]   ;;  %s1122_s8 = inlined_call_operand.hbm [shape: f32[2,32], index: 8, kind: output, shape index: {2}]  }
   0x1   :  { %v29_v0 = vld [vmem:[%s1115_s1 + $0x8] sm:$0xff]  ;;  %v28_v1 = vld [vmem:[%s1115_s1] sm:$0xff]  ;;  %v957_v4 = vld [vmem:[%s1116_s2 + $0x18] sm:$0xff] }
   0x2   :  { %133 = vmatpush.msra.mxu3 %v29_v0  ;;  %v750_v2 = vld [vmem:[%s1114_s0 + $0x6] sm:$0x3]  ;;  %53 = vmatpush.msra.mxu0 %v29_v0  ;;  %v31_v3 = vld [vmem:[%s1114_s0] sm:$0x3] }
   0x3   :  { %79 = vmatpush.msra.mxu1 %v29_v0  ;;  %106 = vmatpush.msra.mxu2 %v29_v0 }
   0x4   :  { %134 = vmatpush.msra.mxu3 %v28_v1  ;;  %54 = vmatpush.msra.mxu0 %v28_v1 }
   0x5   :  { %15 = vsyncpa [#allocation6], 0  ;;  %751 = vmatmul.msk.f32.vlgmr.msra.gmra.mxu3 %vm35_vm0, %v750_v2  ;;  %v963_v5 = vld [vmem:[%s1116_s2 + $0x10] sm:$0xff]  ;;  %745 = vmatmul.msk.f32.vlgmr.msra.gmra.mxu0 %vm35_vm0, %v31_v3  ;;  %v970_v6 = vld [vmem:[%s1116_s2 + $0x8] sm:$0xff]  ;;  %vm229_vm1 = vcmask 261120   ;;  %s892_s22 = smov 64  }
   0x6   :  { %245 = vmatpush.msrb.mxu3 %v957_v4  ;;  %160 = vmatpush.msrb.mxu0 %v29_v0  ;;  %v976_v7 = vld [vmem:[%s1116_s2] sm:$0xff]  ;;  %v752_v40 = vld [vmem:[%s1114_s0 + $0x8] sm:$0x3]  ;;  %vm299_vm6 = vcmask 254976   ;;  %s894_s2 = smov 96   ;;  %s729_s25 = sshll.u32 %s1122_s8, 4  ;;  %s730_s25 = int_to_ptr.hbm [resolvable:$true] %s729_s25 }
   0x7   :  { %80 = vmatpush.msra.mxu1 %v28_v1  ;;  %107 = vmatpush.msra.mxu2 %v28_v1  ;;  %v226_v8 = vld [vmem:[%s1118_s4] sm:$0x3]  ;;  %v746_v39 = vld [vmem:[%s1114_s0 + $0x2] sm:$0x3]  ;;  %s895_s4 = smov [#allocation5]   ;;  %s896_s26 = smov [#allocation3]  }
   0x8   :  { %246 = vmatpush.msrb.mxu3 %v963_v5  ;;  %161 = vmatpush.msrb.mxu0 %v28_v1  ;;  %v995_v9 = vld [vmem:[%s1117_s3] ss:$0 sm:$0xff]  ;;  %s893_s3 = smov 32   ;;  %s727_s23 = sshll.u32 %s895_s4, 4  ;;  %s728_s23 = int_to_ptr.vmem [resolvable:$true] %s727_s23 }
   0x9   :  { %187 = vmatpush.msrb.mxu1 %v29_v0  ;;  %214 = vmatpush.msrb.mxu2 %v29_v0  ;;  %v227_v18 = vld [vmem:[%s1119_s5] sm:$0x3]  ;;  %s716_s27 = sshll.u32 %s896_s26, 4  ;;  %s718_s29 = sshll.u32 %s1121_s7, 4  ;;  %s717_s27 = int_to_ptr.vmem [resolvable:$true] %s716_s27  ;;  %s719_s29 = int_to_ptr.hbm [resolvable:$true] %s718_s29 }
   0xa   :  { %316 = vmatpush.msra.mxu0 %v957_v4  ;;  %247 = vmatpush.msrb.mxu3 %v970_v6 }
   0xb   :  { %188 = vmatpush.msrb.mxu1 %v28_v1  ;;  %215 = vmatpush.msrb.mxu2 %v28_v1 }
   0xc   :  { %317 = vmatpush.msra.mxu0 %v963_v5  ;;  %248 = vmatpush.msrb.mxu3 %v976_v7 }
   0xd   :  { %758 = vmatmul.msk.f32.vlgmr.msrb.gmra.mxu3 %vm229_vm1, %v226_v8  ;;  %747 = vmatmul.msk.f32.vlgmr.msra.gmra.mxu1 %vm35_vm0, %v746_v39 }
   0xe   :  { %318 = vmatpush.msra.mxu0 %v970_v6  ;;  %517 = vmatpush.msra.mxu3 %v957_v4 }
   0xf   :  { %753 = vmatmul.msk.f32.vlgmr.msrb.gmra.mxu0 %vm35_vm0, %v752_v40  ;;  %383 = vmatpush.msra.mxu1 %v957_v4  ;;  %v756_v40 = vld [vmem:[%s1114_s0 + $0xc] sm:$0x3] }
  0x10   :  { %319 = vmatpush.msra.mxu0 %v976_v7  ;;  %518 = vmatpush.msra.mxu3 %v963_v5 }
  0x11   :  { %384 = vmatpush.msra.mxu1 %v963_v5 }
  0x12   :  { %519 = vmatpush.msra.mxu3 %v970_v6  ;;  %584 = vmatpush.msrb.mxu0 %v957_v4 }
  0x13   :  { %385 = vmatpush.msra.mxu1 %v970_v6 }
  0x14   :  { %520 = vmatpush.msra.mxu3 %v976_v7  ;;  %585 = vmatpush.msrb.mxu0 %v963_v5 }
  0x15   :  { %386 = vmatpush.msra.mxu1 %v976_v7 }
  0x16   :  { %586 = vmatpush.msrb.mxu0 %v970_v6 }
  0x18   :  { %587 = vmatpush.msrb.mxu0 %v976_v7 }
  0x82   :  { %v56_v10 = vpop.f32.mrf.mxu0 }
  0x83   :  { %v57_v11 = vadd.f32 %v995_v9, %v56_v10 }
  0x85   :  { %59 = vst [vmem:[#allocation2] sm:$0x3] %v57_v11 }
  0x88   :  { %v136_v12 = vpop.f32.mrf.mxu3 }
  0x89   :  { %v137_v13 = vadd.f32 %v995_v9, %v136_v12  ;;  %v748_v12 = vld [vmem:[%s1114_s0 + $0x4] sm:$0x3] }
  0x8a   :  { %v82_v44 = vpop.f32.mrf.mxu1  ;;  %749 = vmatmul.msk.f32.vlgmr.msra.gmra.mxu2 %vm35_vm0, %v748_v12 }
  0x8b   :  { %140 = vst [vmem:[#allocation2 + $0x6] sm:$0x3] %v137_v13  ;;  %v83_v46 = vadd.f32 %v995_v9, %v82_v44  ;;  %v754_v13 = vld [vmem:[%s1114_s0 + $0xa] sm:$0x3]  ;;  %450 = vmatpush.msra.mxu2 %v957_v4 }
  0x8c   :  { %v228_v14 = vld [vmem:[#allocation2] sm:$0x3]  ;;  %v163_v45 = vpop.f32.mrf.mxu0  ;;  %755 = vmatmul.msk.f32.vlgmr.msrb.gmra.mxu1 %vm35_vm0, %v754_v13 }
  0x8d   :  { %v164_v47 = vadd.f32 %v995_v9, %v163_v45  ;;  %86 = vst [vmem:[#allocation2 + $0x2] sm:$0x3] %v83_v46  ;;  %651 = vmatpush.msrb.mxu1 %v957_v4  ;;  %451 = vmatpush.msra.mxu2 %v963_v5 }
  0x8f   :  { %167 = vst [vmem:[#allocation2 + $0x8] sm:$0x3] %v164_v47  ;;  %652 = vmatpush.msrb.mxu1 %v963_v5  ;;  %452 = vmatpush.msra.mxu2 %v970_v6 }
  0x90   :  { %v250_v15 = vpop.f32.mrf.mxu3 }
  0x91   :  { %v253_v16 = vadd.f32 %v250_v15, %v228_v14  ;;  %653 = vmatpush.msrb.mxu1 %v970_v6  ;;  %453 = vmatpush.msra.mxu2 %v976_v7 }
  0x92   :  { %757 = vmatmul.msk.f32.vlgmr.msrb.gmra.mxu2 %vm35_vm0, %v756_v40  ;;  %v435_v46 = vld [vmem:[#allocation2 + $0x6] sm:$0x3] }
  0x93   :  { %784 = vtanh.f32 %v253_v16  ;;  %v759_v19 = vmul.f32 -1.442695, %v253_v16  ;;  %654 = vmatpush.msrb.mxu1 %v976_v7 }
  0x94   :  { %v301_v48 = vld [vmem:[#allocation2 + $0x2] sm:$0x3] }
  0x95   :  { %786 = vpow2.f32 %v759_v19 }
  0x96   :  { %v502_v12 = vld [vmem:[#allocation2 + $0x8] sm:$0x3] }
  0x99   :  { %v785_v17 = vpop.eup %784 }
  0x9a   :  { %280 = vrot.lane.b32.xlu0 %v785_v17, %s892_s22 }
  0x9b   :  { %v787_v20 = vpop.eup %786 }
  0x9c   :  { %v257_v21 = vadd.f32 1.0, %v787_v20 }
  0x9e   :  { %788 = vrcp.f32 %v257_v21  ;;  %v269_v27 = vand.u32 2147483648, %v257_v21  ;;  %vm263_vm3 = vweird.f32 %v257_v21  ;;  %v267_v28 = vand.u32 2147483647, %v257_v21 }
  0xa0   :  { %v270_v30 = vor.u32 1.1754944e-38, %v269_v27  ;;  %vm268_vm5 = vcmp.eq.f32.partialorder %v267_v28, 8.507059e+37 }
  0xa2   :  { %275 = vrot.lane.b32.xlu0 %v227_v18, %s893_s3 }
  0xa4   :  { %v789_v22 = vpop.eup %788 }
  0xa5   :  { %v259_v23 = vmul.f32 %v789_v22, %v257_v21  ;;  %vm264_vm2 = vweird.f32 %v789_v22 }
  0xa6   :  { %vm265_vm4 = vmor %vm263_vm3, %vm264_vm2 }
  0xa7   :  { %v260_v24 = vsub.f32 1.0, %v259_v23 }
  0xa9   :  { %v261_v25 = vmul.f32 %v789_v22, %v260_v24 }
  0xab   :  { %v262_v26 = vadd.f32 %v789_v22, %v261_v25 }
  0xad   :  { %v266_v29 = vsel %vm265_vm4, %v789_v22, %v262_v26 }
  0xae   :  { %v271_v32 = vsel %vm268_vm5, %v270_v30, %v266_v29 }
 0x109   :  { %v190_v4 = vpop.f32.mrf.mxu1 }
 0x10a   :  { %v191_v5 = vadd.f32 %v995_v9, %v190_v4 }
 0x10c   :  { %v281_v31 = vpop.permute.xlu0 %280  ;;  %194 = vst [vmem:[#allocation2 + $0xa] sm:$0x3] %v191_v5 }
 0x10d   :  { %v283_v33 = vmul.f32 %v281_v31, %v271_v32  ;;  %v109_v6 = vpop.f32.mrf.mxu2 }
 0x10e   :  { %v110_v17 = vadd.f32 %v995_v9, %v109_v6 }
 0x10f   :  { %285 = vrot.lane.b32.xlu1 %v283_v33, %s893_s3 }
 0x110   :  { %113 = vst [vmem:[#allocation2 + $0x4] sm:$0x3] %v110_v17 }
 0x114   :  { %v276_v34 = vpop.permute.xlu0 %275 }
 0x115   :  { %v278_v35 = vmul.f32 %v276_v34, %v271_v32 }
 0x117   :  { %v368_v7 = vld [vmem:[#allocation2 + $0x4] sm:$0x3] }
 0x181   :  { %v286_v36 = vpop.permute.xlu1 %285 }
 0x182   :  { %v288_v37 = vadd.f32 %v286_v36, %v278_v35 }
 0x184   :  { %790 = vtanh.f32 %v288_v37 }
 0x18a   :  { %v791_v38 = vpop.eup %790 }
 0x18b   :  { %291 = vrot.lane.b32.xlu1 %v791_v38, %s892_s22 }
 0x1fd   :  { %v292_v41 = vpop.permute.xlu1 %291 }
 0x1fe   :  { %v294_v42 = vmul.f32 %v292_v41, %v271_v32 }
 0x200   :  { %296 = vrot.lane.b32.xlu2 %v294_v42, %s893_s3 }
 0x25a   :  { %v297_v43 = vpop.permute.xlu2 %296 }
 0x25b   :  { %300 = vst.msk [vmem:[%s1120_s6] sm:$0x3] %vm299_vm6, %v297_v43  ;;  %760 = vmatmul.msk.f32.vlgmr.msra.gmra.mxu0 %vm229_vm1, %v297_v43  ;;  %v217_v43 = vpop.f32.mrf.mxu2 }
 0x25c   :  { %v218_v44 = vadd.f32 %v995_v9, %v217_v43 }
 0x25e   :  { %221 = vst [vmem:[#allocation2 + $0xc] sm:$0x3] %v218_v44 }
 0x2d8   :  { %v321_v49 = vpop.f32.mrf.mxu0 }
 0x2d9   :  { %v324_v50 = vadd.f32 %v321_v49, %v301_v48 }
 0x2db   :  { %792 = vtanh.f32 %v324_v50  ;;  %v761_v52 = vmul.f32 -1.442695, %v324_v50 }
 0x2dd   :  { %794 = vpow2.f32 %v761_v52 }
 0x2e1   :  { %v793_v51 = vpop.eup %792 }
 0x2e2   :  { %347 = vrot.lane.b32.xlu2 %v793_v51, %s892_s22 }
 0x2e3   :  { %v795_v53 = vpop.eup %794 }
 0x2e4   :  { %v328_v54 = vadd.f32 1.0, %v795_v53 }
 0x2e6   :  { %796 = vrcp.f32 %v328_v54  ;;  %v340_v60 = vand.u32 2147483648, %v328_v54  ;;  %vm334_vm8 = vweird.f32 %v328_v54  ;;  %v338_v61 = vand.u32 2147483647, %v328_v54 }
 0x2e8   :  { %v341_v63 = vor.u32 1.1754944e-38, %v340_v60  ;;  %vm339_vm10 = vcmp.eq.f32.partialorder %v338_v61, 8.507059e+37 }
 0x2ec   :  { %v797_v55 = vpop.eup %796 }
 0x2ed   :  { %v330_v56 = vmul.f32 %v797_v55, %v328_v54  ;;  %vm335_vm7 = vweird.f32 %v797_v55 }
 0x2ee   :  { %vm336_vm9 = vmor %vm334_vm8, %vm335_vm7 }
 0x2ef   :  { %v331_v57 = vsub.f32 1.0, %v330_v56 }
 0x2f1   :  { %v332_v58 = vmul.f32 %v797_v55, %v331_v57 }
 0x2f3   :  { %v333_v59 = vadd.f32 %v797_v55, %v332_v58 }
 0x2f5   :  { %v337_v62 = vsel %vm336_vm9, %v797_v55, %v333_v59 }
 0x2f6   :  { %v342_v1 = vsel %vm339_vm10, %v341_v63, %v337_v62 }
 0x2f7   :  { %v345_v3 = vmul.f32 %v342_v1, %v288_v37 }
 0x33c   :  { %v348_v0 = vpop.permute.xlu2 %347 }
 0x33d   :  { %v350_v2 = vmul.f32 %v348_v0, %v342_v1 }
 0x33f   :  { %352 = vrot.lane.b32.xlu0 %v350_v2, %s893_s3 }
 0x3b1   :  { %v353_v8 = vpop.permute.xlu0 %352 }
 0x3b2   :  { %v355_v10 = vadd.f32 %v353_v8, %v345_v3 }
 0x3b4   :  { %798 = vtanh.f32 %v355_v10 }
 0x3ba   :  { %v799_v11 = vpop.eup %798 }
 0x3bb   :  { %358 = vrot.lane.b32.xlu1 %v799_v11, %s892_s22 }
 0x42d   :  { %v359_v14 = vpop.permute.xlu1 %358 }
 0x42e   :  { %v361_v15 = vmul.f32 %v359_v14, %v342_v1 }
 0x430   :  { %363 = vrot.lane.b32.xlu2 %v361_v15, %s893_s3 }
 0x48a   :  { %v364_v16 = vpop.permute.xlu2 %363 }
 0x48b   :  { %762 = vst.msk [vmem:[%s1120_s6 + $0x2] sm:$0x3] %vm299_vm6, %v364_v16  ;;  %763 = vmatmul.msk.f32.vlgmr.msra.gmra.mxu1 %vm229_vm1, %v364_v16 }
 0x508   :  { %v388_v18 = vpop.f32.mrf.mxu1 }
 0x509   :  { %v391_v19 = vadd.f32 %v388_v18, %v368_v7 }
 0x50b   :  { %800 = vtanh.f32 %v391_v19  ;;  %v764_v21 = vmul.f32 -1.442695, %v391_v19 }
 0x50d   :  { %802 = vpow2.f32 %v764_v21 }
 0x511   :  { %v801_v20 = vpop.eup %800 }
 0x512   :  { %414 = vrot.lane.b32.xlu0 %v801_v20, %s892_s22 }
 0x513   :  { %v803_v22 = vpop.eup %802 }
 0x514   :  { %v395_v23 = vadd.f32 1.0, %v803_v22 }
 0x516   :  { %804 = vrcp.f32 %v395_v23  ;;  %v407_v29 = vand.u32 2147483648, %v395_v23  ;;  %vm401_vm12 = vweird.f32 %v395_v23  ;;  %v405_v30 = vand.u32 2147483647, %v395_v23 }
 0x518   :  { %v408_v32 = vor.u32 1.1754944e-38, %v407_v29  ;;  %vm406_vm14 = vcmp.eq.f32.partialorder %v405_v30, 8.507059e+37 }
 0x51c   :  { %v805_v24 = vpop.eup %804 }
 0x51d   :  { %v397_v25 = vmul.f32 %v805_v24, %v395_v23  ;;  %vm402_vm11 = vweird.f32 %v805_v24 }
 0x51e   :  { %vm403_vm13 = vmor %vm401_vm12, %vm402_vm11 }
 0x51f   :  { %v398_v26 = vsub.f32 1.0, %v397_v25 }
 0x521   :  { %v399_v27 = vmul.f32 %v805_v24, %v398_v26 }
 0x523   :  { %v400_v28 = vadd.f32 %v805_v24, %v399_v27 }
 0x525   :  { %v404_v31 = vsel %vm403_vm13, %v805_v24, %v400_v28 }
 0x526   :  { %v409_v34 = vsel %vm406_vm14, %v408_v32, %v404_v31 }
 0x527   :  { %v412_v36 = vmul.f32 %v409_v34, %v355_v10 }
 0x584   :  { %v415_v33 = vpop.permute.xlu0 %414 }
 0x585   :  { %v417_v35 = vmul.f32 %v415_v33, %v409_v34 }
 0x587   :  { %419 = vrot.lane.b32.xlu1 %v417_v35, %s893_s3 }
 0x5f9   :  { %v420_v37 = vpop.permute.xlu1 %419 }
 0x5fa   :  { %v422_v38 = vadd.f32 %v420_v37, %v412_v36 }
 0x5fc   :  { %806 = vtanh.f32 %v422_v38 }
 0x602   :  { %v807_v39 = vpop.eup %806 }
 0x603   :  { %425 = vrot.lane.b32.xlu2 %v807_v39, %s892_s22 }
 0x65d   :  { %v426_v41 = vpop.permute.xlu2 %425 }
 0x65e   :  { %v428_v42 = vmul.f32 %v426_v41, %v409_v34  ;;  %v569_v34 = vld [vmem:[#allocation2 + $0xa] sm:$0x3] }
 0x660   :  { %430 = vrot.lane.b32.xlu0 %v428_v42, %s893_s3 }
 0x6d2   :  { %v431_v45 = vpop.permute.xlu0 %430 }
 0x6d3   :  { %765 = vst.msk [vmem:[%s1120_s6 + $0x4] sm:$0x3] %vm299_vm6, %v431_v45  ;;  %766 = vmatmul.msk.f32.vlgmr.msra.gmra.mxu2 %vm229_vm1, %v431_v45 }
 0x756   :  { %v455_v47 = vpop.f32.mrf.mxu2 }
 0x757   :  { %v458_v48 = vadd.f32 %v455_v47, %v435_v46 }
 0x759   :  { %808 = vtanh.f32 %v458_v48  ;;  %v767_v50 = vmul.f32 -1.442695, %v458_v48 }
 0x75b   :  { %810 = vpow2.f32 %v767_v50 }
 0x75f   :  { %v809_v49 = vpop.eup %808 }
 0x760   :  { %481 = vrot.lane.b32.xlu1 %v809_v49, %s892_s22 }
 0x761   :  { %v811_v51 = vpop.eup %810 }
 0x762   :  { %v462_v9 = vadd.f32 1.0, %v811_v51 }
 0x764   :  { %812 = vrcp.f32 %v462_v9  ;;  %v474_v57 = vand.u32 2147483648, %v462_v9  ;;  %vm468_vm0 = vweird.f32 %v462_v9  ;;  %v472_v58 = vand.u32 2147483647, %v462_v9 }
 0x766   :  { %v475_v60 = vor.u32 1.1754944e-38, %v474_v57  ;;  %vm473_vm3 = vcmp.eq.f32.partialorder %v472_v58, 8.507059e+37 }
 0x76a   :  { %v813_v52 = vpop.eup %812 }
 0x76b   :  { %v464_v53 = vmul.f32 %v813_v52, %v462_v9  ;;  %vm469_vm15 = vweird.f32 %v813_v52 }
 0x76c   :  { %vm470_vm2 = vmor %vm468_vm0, %vm469_vm15 }
 0x76d   :  { %v465_v54 = vsub.f32 1.0, %v464_v53 }
 0x76f   :  { %v466_v55 = vmul.f32 %v813_v52, %v465_v54 }
 0x771   :  { %v467_v56 = vadd.f32 %v813_v52, %v466_v55 }
 0x773   :  { %v471_v59 = vsel %vm470_vm2, %v813_v52, %v467_v56 }
 0x774   :  { %v476_v62 = vsel %vm473_vm3, %v475_v60, %v471_v59  ;;  %v636_v59 = vld [vmem:[#allocation2 + $0xc] sm:$0x3] }
 0x775   :  { %v479_v0 = vmul.f32 %v476_v62, %v422_v38 }
 0x7d2   :  { %v482_v61 = vpop.permute.xlu1 %481 }
 0x7d3   :  { %v484_v63 = vmul.f32 %v482_v61, %v476_v62 }
 0x7d5   :  { %486 = vrot.lane.b32.xlu2 %v484_v63, %s893_s3 }
 0x82f   :  { %v487_v1 = vpop.permute.xlu2 %486 }
 0x830   :  { %v489_v2 = vadd.f32 %v487_v1, %v479_v0 }
 0x832   :  { %814 = vtanh.f32 %v489_v2 }
 0x838   :  { %v815_v3 = vpop.eup %814 }
 0x839   :  { %492 = vrot.lane.b32.xlu0 %v815_v3, %s892_s22 }
 0x8ab   :  { %v493_v8 = vpop.permute.xlu0 %492 }
 0x8ac   :  { %v495_v10 = vmul.f32 %v493_v8, %v476_v62 }
 0x8ae   :  { %497 = vrot.lane.b32.xlu1 %v495_v10, %s893_s3 }
 0x920   :  { %v498_v11 = vpop.permute.xlu1 %497 }
 0x921   :  { %768 = vst.msk [vmem:[%s1120_s6 + $0x6] sm:$0x3] %vm299_vm6, %v498_v11  ;;  %769 = vmatmul.msk.f32.vlgmr.msra.gmra.mxu3 %vm229_vm1, %v498_v11 }
 0x9a4   :  { %v522_v13 = vpop.f32.mrf.mxu3 }
 0x9a5   :  { %v525_v14 = vadd.f32 %v522_v13, %v502_v12 }
 0x9a7   :  { %816 = vtanh.f32 %v525_v14  ;;  %v770_v16 = vmul.f32 -1.442695, %v525_v14 }
 0x9a9   :  { %818 = vpow2.f32 %v770_v16 }
 0x9ad   :  { %v817_v15 = vpop.eup %816 }
 0x9ae   :  { %548 = vrot.lane.b32.xlu2 %v817_v15, %s892_s22 }
 0x9af   :  { %v819_v4 = vpop.eup %818 }
 0x9b0   :  { %v529_v5 = vadd.f32 1.0, %v819_v4 }
 0x9b2   :  { %820 = vrcp.f32 %v529_v5  ;;  %v541_v20 = vand.u32 2147483648, %v529_v5  ;;  %vm535_vm5 = vweird.f32 %v529_v5  ;;  %v539_v21 = vand.u32 2147483647, %v529_v5 }
 0x9b4   :  { %v542_v23 = vor.u32 1.1754944e-38, %v541_v20  ;;  %vm540_vm8 = vcmp.eq.f32.partialorder %v539_v21, 8.507059e+37 }
 0x9b8   :  { %v821_v6 = vpop.eup %820 }
 0x9b9   :  { %v531_v17 = vmul.f32 %v821_v6, %v529_v5  ;;  %vm536_vm4 = vweird.f32 %v821_v6 }
 0x9ba   :  { %vm537_vm7 = vmor %vm535_vm5, %vm536_vm4 }
 0x9bb   :  { %v532_v7 = vsub.f32 1.0, %v531_v17 }
 0x9bd   :  { %v533_v18 = vmul.f32 %v821_v6, %v532_v7 }
 0x9bf   :  { %v534_v19 = vadd.f32 %v821_v6, %v533_v18 }
 0x9c1   :  { %v538_v22 = vsel %vm537_vm7, %v821_v6, %v534_v19 }
 0x9c2   :  { %v543_v25 = vsel %vm540_vm8, %v542_v23, %v538_v22 }
 0x9c3   :  { %v546_v27 = vmul.f32 %v543_v25, %v489_v2 }
 0xa08   :  { %v549_v24 = vpop.permute.xlu2 %548 }
 0xa09   :  { %v551_v26 = vmul.f32 %v549_v24, %v543_v25 }
 0xa0b   :  { %553 = vrot.lane.b32.xlu0 %v551_v26, %s893_s3 }
 0xa7d   :  { %v554_v28 = vpop.permute.xlu0 %553 }
 0xa7e   :  { %v556_v29 = vadd.f32 %v554_v28, %v546_v27 }
 0xa80   :  { %822 = vtanh.f32 %v556_v29 }
 0xa86   :  { %v823_v30 = vpop.eup %822 }
 0xa87   :  { %559 = vrot.lane.b32.xlu1 %v823_v30, %s892_s22 }
 0xaf9   :  { %v560_v31 = vpop.permute.xlu1 %559 }
 0xafa   :  { %v562_v32 = vmul.f32 %v560_v31, %v543_v25 }
 0xafc   :  { %564 = vrot.lane.b32.xlu2 %v562_v32, %s893_s3 }
 0xb56   :  { %v565_v33 = vpop.permute.xlu2 %564 }
 0xb57   :  { %771 = vst.msk [vmem:[%s1120_s6 + $0x8] sm:$0x3] %vm299_vm6, %v565_v33  ;;  %772 = vmatmul.msk.f32.vlgmr.msrb.gmra.mxu0 %vm229_vm1, %v565_v33 }
 0xbd4   :  { %v589_v35 = vpop.f32.mrf.mxu0 }
 0xbd5   :  { %v592_v36 = vadd.f32 %v589_v35, %v569_v34 }
 0xbd7   :  { %824 = vtanh.f32 %v592_v36  ;;  %v773_v38 = vmul.f32 -1.442695, %v592_v36 }
 0xbd9   :  { %826 = vpow2.f32 %v773_v38 }
 0xbdd   :  { %v825_v37 = vpop.eup %824 }
 0xbde   :  { %615 = vrot.lane.b32.xlu0 %v825_v37, %s892_s22 }
 0xbdf   :  { %v827_v39 = vpop.eup %826 }
 0xbe0   :  { %v596_v40 = vadd.f32 1.0, %v827_v39 }
 0xbe2   :  { %828 = vrcp.f32 %v596_v40  ;;  %v608_v46 = vand.u32 2147483648, %v596_v40  ;;  %vm602_vm10 = vweird.f32 %v596_v40  ;;  %v606_v47 = vand.u32 2147483647, %v596_v40 }
 0xbe4   :  { %v609_v49 = vor.u32 1.1754944e-38, %v608_v46  ;;  %vm607_vm12 = vcmp.eq.f32.partialorder %v606_v47, 8.507059e+37 }
 0xbe8   :  { %v829_v41 = vpop.eup %828 }
 0xbe9   :  { %v598_v42 = vmul.f32 %v829_v41, %v596_v40  ;;  %vm603_vm9 = vweird.f32 %v829_v41 }
 0xbea   :  { %vm604_vm11 = vmor %vm602_vm10, %vm603_vm9 }
 0xbeb   :  { %v599_v43 = vsub.f32 1.0, %v598_v42 }
 0xbed   :  { %v600_v44 = vmul.f32 %v829_v41, %v599_v43 }
 0xbef   :  { %v601_v45 = vadd.f32 %v829_v41, %v600_v44 }
 0xbf1   :  { %v605_v48 = vsel %vm604_vm11, %v829_v41, %v601_v45 }
 0xbf2   :  { %v610_v51 = vsel %vm607_vm12, %v609_v49, %v605_v48 }
 0xbf3   :  { %v613_v52 = vmul.f32 %v610_v51, %v556_v29 }
 0xc50   :  { %v616_v50 = vpop.permute.xlu0 %615 }
 0xc51   :  { %v618_v9 = vmul.f32 %v616_v50, %v610_v51 }
 0xc53   :  { %620 = vrot.lane.b32.xlu1 %v618_v9, %s893_s3 }
 0xcc5   :  { %v621_v53 = vpop.permute.xlu1 %620 }
 0xcc6   :  { %v623_v54 = vadd.f32 %v621_v53, %v613_v52 }
 0xcc8   :  { %830 = vtanh.f32 %v623_v54 }
 0xcce   :  { %v831_v55 = vpop.eup %830 }
 0xccf   :  { %626 = vrot.lane.b32.xlu2 %v831_v55, %s892_s22 }
 0xd29   :  { %v627_v56 = vpop.permute.xlu2 %626 }
 0xd2a   :  { %v629_v57 = vmul.f32 %v627_v56, %v610_v51 }
 0xd2c   :  { %631 = vrot.lane.b32.xlu0 %v629_v57, %s893_s3 }
 0xd9e   :  { %v632_v58 = vpop.permute.xlu0 %631 }
 0xd9f   :  { %774 = vst.msk [vmem:[%s1120_s6 + $0xa] sm:$0x3] %vm299_vm6, %v632_v58  ;;  %775 = vmatmul.msk.f32.vlgmr.msrb.gmra.mxu1 %vm229_vm1, %v632_v58 }
 0xe1c   :  { %v656_v60 = vpop.f32.mrf.mxu1 }
 0xe1d   :  { %v659_v61 = vadd.f32 %v656_v60, %v636_v59 }
 0xe1f   :  { %832 = vtanh.f32 %v659_v61  ;;  %v776_v63 = vmul.f32 -1.442695, %v659_v61 }
 0xe21   :  { %834 = vpow2.f32 %v776_v63 }
 0xe25   :  { %v833_v62 = vpop.eup %832 }
 0xe26   :  { %682 = vrot.lane.b32.xlu1 %v833_v62, %s892_s22 }
 0xe27   :  { %v835_v0 = vpop.eup %834 }
 0xe28   :  { %v663_v1 = vadd.f32 1.0, %v835_v0 }
 0xe2a   :  { %836 = vrcp.f32 %v663_v1  ;;  %v675_v12 = vand.u32 2147483648, %v663_v1  ;;  %vm669_vm1 = vweird.f32 %v663_v1  ;;  %v673_v13 = vand.u32 2147483647, %v663_v1 }
 0xe2c   :  { %v676_v15 = vor.u32 1.1754944e-38, %v675_v12  ;;  %vm674_vm15 = vcmp.eq.f32.partialorder %v673_v13, 8.507059e+37 }
 0xe30   :  { %v837_v2 = vpop.eup %836 }
 0xe31   :  { %v665_v3 = vmul.f32 %v837_v2, %v663_v1  ;;  %vm670_vm13 = vweird.f32 %v837_v2 }
 0xe32   :  { %vm671_vm14 = vmor %vm669_vm1, %vm670_vm13 }
 0xe33   :  { %v666_v8 = vsub.f32 1.0, %v665_v3 }
 0xe35   :  { %v667_v10 = vmul.f32 %v837_v2, %v666_v8 }
 0xe37   :  { %v668_v11 = vadd.f32 %v837_v2, %v667_v10 }
 0xe39   :  { %v672_v14 = vsel %vm671_vm14, %v837_v2, %v668_v11 }
 0xe3a   :  { %v677_v4 = vsel %vm674_vm15, %v676_v15, %v672_v14 }
 0xe3b   :  { %v680_v6 = vmul.f32 %v677_v4, %v623_v54 }
 0xe98   :  { %v683_v16 = vpop.permute.xlu1 %682 }
 0xe99   :  { %v685_v5 = vmul.f32 %v683_v16, %v677_v4 }
 0xe9b   :  { %687 = vrot.lane.b32.xlu2 %v685_v5, %s893_s3 }
 0xef5   :  { %v688_v17 = vpop.permute.xlu2 %687 }
 0xef6   :  { %v690_v7 = vadd.f32 %v688_v17, %v680_v6 }
 0xef8   :  { %838 = vtanh.f32 %v690_v7  ;;  %705 = vrot.lane.b32.xlu2 %v690_v7, %s894_s2 }
 0xefe   :  { %v839_v18 = vpop.eup %838 }
 0xeff   :  { %693 = vrot.lane.b32.xlu0 %v839_v18, %s892_s22 }
 0xf52   :  { %v706_v19 = vpop.permute.xlu2 %705 }
 0xf53   :  { %708 = vst.msk [vmem:[#allocation5] sm:$0x3] %vm299_vm6, %v706_v19 }
 0xf54   :  { %732 = dma.vmem_to_hbm [thread:$0]  %s728_s23, 32, %s730_s25, [#allocation6]  }
 0xf71   :  { %v694_v20 = vpop.permute.xlu0 %693 }
 0xf72   :  { %v696_v21 = vmul.f32 %v694_v20, %v677_v4 }
 0xf74   :  { %698 = vrot.lane.b32.xlu1 %v696_v21, %s893_s3 }
 0xfe6   :  { %v699_v22 = vpop.permute.xlu1 %698 }
 0xfe7   :  { %777 = vst.msk [vmem:[%s1120_s6 + $0xc] sm:$0x3] %vm299_vm6, %v699_v22 }
 0xfe8   :  { %703 = vst.msk [vmem:[#allocation3] sm:$0x3] %vm299_vm6, %v699_v22 }
 0xfe9   :  { %721 = dma.vmem_to_hbm [thread:$0]  %s717_s27, 32, %s719_s29, [#allocation4]  }
 0xfea   :  { %888 = dma.done.wait [#allocation4], 32  }
 0xfeb   :  { %889 = vsyncadd [#allocation4], 4294967264 }
 0xfec   :  { %890 = dma.done.wait [#allocation6], 32  }
 0xfed   :  { %891 = vsyncadd [#allocation6], 4294967264 }
 0xfee   :  { %743 = vsyncpa [#allocation4], 1 }
 0xfef   :  { %744 = vsyncpa [#allocation6], 1 }

// kernel: seq2seq_forward.3
= control target key start
LH: loop header
LB: loop body
LE: loop exit
PB: predicated region body
PF: predicated region fallthrough
CT: control target
= control target key end

     0   :  { %vm34_vm0 = vcmask 130048   ;;  %s1176_s0 = inlined_call_operand.vmem [shape: f32[8,2,16], index: 0, kind: input, shape index: {}]   ;;  %s1177_s1 = inlined_call_operand.vmem [shape: f32[16,128], index: 1, kind: input, shape index: {}]   ;;  %s1178_s2 = inlined_call_operand.vmem [shape: f32[32,128], index: 2, kind: input, shape index: {}]   ;;  %s1179_s3 = inlined_call_operand.vmem [shape: f32[1,128], index: 3, kind: input, shape index: {}]   ;;  %s1180_s4 = inlined_call_operand.vmem [shape: f32[2,32], index: 4, kind: input, shape index: {}, may-alias: {4,5}]   ;;  %s1181_s5 = inlined_call_operand.vmem [shape: f32[2,32], index: 5, kind: input, shape index: {}, may-alias: {4,5}]   ;;  %s1182_s6 = inlined_call_operand.hbm [shape: f32[8,2,32], index: 6, kind: output, shape index: {0}]   ;;  %s1183_s7 = inlined_call_operand.vmem [shape: f32[2,32], index: 7, kind: output, shape index: {1}]   ;;  %s1184_s8 = inlined_call_operand.vmem [shape: f32[2,32], index: 8, kind: output, shape index: {2}]  }
   0x1   :  { %v28_v0 = vld [vmem:[%s1177_s1 + $0x8] sm:$0xff]  ;;  %v27_v1 = vld [vmem:[%s1177_s1] sm:$0xff] }
   0x2   :  { %52 = vmatpush.msra.mxu0 %v28_v0  ;;  %v30_v2 = vld [vmem:[%s1176_s0] sm:$0x3]  ;;  %78 = vmatpush.msra.mxu1 %v28_v0 }
   0x3   :  { %105 = vmatpush.msra.mxu2 %v28_v0  ;;  %132 = vmatpush.msra.mxu3 %v28_v0 }
   0x4   :  { %53 = vmatpush.msra.mxu0 %v27_v1  ;;  %79 = vmatpush.msra.mxu1 %v27_v1 }
   0x5   :  { %14 = vsyncpa [#allocation4], 0  ;;  %828 = vmatmul.msk.f32.vlgmr.msra.gmra.mxu0 %vm34_vm0, %v30_v2  ;;  %v1018_v3 = vld [vmem:[%s1178_s2 + $0x18] sm:$0xff]  ;;  %106 = vmatpush.msra.mxu2 %v27_v1  ;;  %v1023_v4 = vld [vmem:[%s1178_s2 + $0x10] sm:$0xff]  ;;  %vm255_vm1 = vcmask 261120   ;;  %vm325_vm6 = vcmask 254976  }
   0x6   :  { %186 = vmatpush.msrb.mxu1 %v28_v0  ;;  %159 = vmatpush.msrb.mxu0 %v28_v0  ;;  %v835_v5 = vld [vmem:[%s1176_s0 + $0x8] sm:$0x3]  ;;  %v1039_v7 = vld [vmem:[%s1178_s2] sm:$0xff]  ;;  %v837_v40 = vld [vmem:[%s1176_s0 + $0xa] sm:$0x3]  ;;  %s958_s15 = smov [#allocation3]  }
   0x7   :  { %213 = vmatpush.msrb.mxu2 %v28_v0  ;;  %133 = vmatpush.msra.mxu3 %v27_v1  ;;  %v1033_v6 = vld [vmem:[%s1178_s2 + $0x8] sm:$0xff]  ;;  %v252_v8 = vld [vmem:[%s1180_s4] sm:$0x3]  ;;  %s955_s4 = smov 64   ;;  %v829_v39 = vld [vmem:[%s1176_s0 + $0x2] sm:$0x3] }
   0x8   :  { %187 = vmatpush.msrb.mxu1 %v27_v1  ;;  %160 = vmatpush.msrb.mxu0 %v27_v1  ;;  %v1054_v9 = vld [vmem:[%s1179_s3] ss:$0 sm:$0xff]  ;;  %s956_s3 = smov 32   ;;  %s806_s16 = sshll.u32 %s958_s15, 4  ;;  %s807_s16 = int_to_ptr.vmem [resolvable:$true] %s806_s16 }
   0x9   :  { %214 = vmatpush.msrb.mxu2 %v27_v1  ;;  %240 = vmatpush.msrb.mxu3 %v28_v0  ;;  %v253_v18 = vld [vmem:[%s1181_s5] sm:$0x3]  ;;  %s808_s19 = sshll.u32 %s1182_s6, 4  ;;  %s809_s19 = int_to_ptr.hbm [resolvable:$true] %s808_s19 }
   0xa   :  { %271 = vmatpush.msra.mxu0 %v1018_v3  ;;  %830 = vmatmul.msk.f32.vlgmr.msra.gmra.mxu1 %vm34_vm0, %v829_v39 }
   0xb   :  { %241 = vmatpush.msrb.mxu3 %v27_v1  ;;  %342 = vmatpush.msra.mxu1 %v1018_v3 }
   0xc   :  { %272 = vmatpush.msra.mxu0 %v1023_v4 }
   0xd   :  { %836 = vmatmul.msk.f32.vlgmr.msrb.gmra.mxu0 %vm34_vm0, %v835_v5  ;;  %343 = vmatpush.msra.mxu1 %v1023_v4 }
   0xe   :  { %273 = vmatpush.msra.mxu0 %v1033_v6 }
   0xf   :  { %344 = vmatpush.msra.mxu1 %v1033_v6 }
  0x10   :  { %274 = vmatpush.msra.mxu0 %v1039_v7 }
  0x11   :  { %345 = vmatpush.msra.mxu1 %v1039_v7 }
  0x12   :  { %543 = vmatpush.msrb.mxu0 %v1018_v3  ;;  %838 = vmatmul.msk.f32.vlgmr.msrb.gmra.mxu1 %vm34_vm0, %v837_v40 }
  0x13   :  { %610 = vmatpush.msrb.mxu1 %v1018_v3 }
  0x14   :  { %544 = vmatpush.msrb.mxu0 %v1023_v4 }
  0x15   :  { %843 = vmatmul.msk.f32.vlgmr.msra.gmra.mxu0 %vm255_vm1, %v252_v8  ;;  %611 = vmatpush.msrb.mxu1 %v1023_v4 }
  0x16   :  { %545 = vmatpush.msrb.mxu0 %v1033_v6 }
  0x17   :  { %612 = vmatpush.msrb.mxu1 %v1033_v6 }
  0x18   :  { %546 = vmatpush.msrb.mxu0 %v1039_v7 }
  0x19   :  { %613 = vmatpush.msrb.mxu1 %v1039_v7 }
  0x82   :  { %v55_v10 = vpop.f32.mrf.mxu0 }
  0x83   :  { %v56_v11 = vadd.f32 %v1054_v9, %v55_v10 }
  0x85   :  { %58 = vst [vmem:[#allocation2] sm:$0x3] %v56_v11 }
  0x87   :  { %v81_v44 = vpop.f32.mrf.mxu1 }
  0x88   :  { %v82_v45 = vadd.f32 %v1054_v9, %v81_v44  ;;  %v833_v44 = vld [vmem:[%s1176_s0 + $0x6] sm:$0x3] }
  0x89   :  { %834 = vmatmul.msk.f32.vlgmr.msra.gmra.mxu3 %vm34_vm0, %v833_v44 }
  0x8a   :  { %v162_v12 = vpop.f32.mrf.mxu0  ;;  %85 = vst [vmem:[#allocation2 + $0x2] sm:$0x3] %v82_v45  ;;  %476 = vmatpush.msra.mxu3 %v1018_v3  ;;  %v841_v45 = vld [vmem:[%s1176_s0 + $0xe] sm:$0x3] }
  0x8b   :  { %v163_v13 = vadd.f32 %v1054_v9, %v162_v12  ;;  %v831_v12 = vld [vmem:[%s1176_s0 + $0x4] sm:$0x3] }
  0x8c   :  { %v254_v14 = vld [vmem:[#allocation2] sm:$0x3]  ;;  %832 = vmatmul.msk.f32.vlgmr.msra.gmra.mxu2 %vm34_vm0, %v831_v12  ;;  %477 = vmatpush.msra.mxu3 %v1023_v4 }
  0x8d   :  { %166 = vst [vmem:[#allocation2 + $0x8] sm:$0x3] %v163_v13  ;;  %409 = vmatpush.msra.mxu2 %v1018_v3  ;;  %v839_v13 = vld [vmem:[%s1176_s0 + $0xc] sm:$0x3]  ;;  %s957_s0 = smov 96  }
  0x8e   :  { %478 = vmatpush.msra.mxu3 %v1033_v6 }
  0x8f   :  { %v189_v46 = vpop.f32.mrf.mxu1  ;;  %410 = vmatpush.msra.mxu2 %v1023_v4 }
  0x90   :  { %v190_v47 = vadd.f32 %v1054_v9, %v189_v46  ;;  %479 = vmatpush.msra.mxu3 %v1039_v7 }
  0x91   :  { %v327_v48 = vld [vmem:[#allocation2 + $0x2] sm:$0x3]  ;;  %411 = vmatpush.msra.mxu2 %v1033_v6  ;;  %842 = vmatmul.msk.f32.vlgmr.msrb.gmra.mxu3 %vm34_vm0, %v841_v45 }
  0x92   :  { %v276_v15 = vpop.f32.mrf.mxu0  ;;  %193 = vst [vmem:[#allocation2 + $0xa] sm:$0x3] %v190_v47  ;;  %744 = vmatpush.msrb.mxu3 %v1018_v3 }
  0x93   :  { %v279_v16 = vadd.f32 %v276_v15, %v254_v14  ;;  %412 = vmatpush.msra.mxu2 %v1039_v7 }
  0x94   :  { %840 = vmatmul.msk.f32.vlgmr.msrb.gmra.mxu2 %vm34_vm0, %v839_v13  ;;  %745 = vmatpush.msrb.mxu3 %v1023_v4 }
  0x95   :  { %865 = vtanh.f32 %v279_v16  ;;  %v844_v19 = vmul.f32 -1.442695, %v279_v16  ;;  %677 = vmatpush.msrb.mxu2 %v1018_v3 }
  0x96   :  { %746 = vmatpush.msrb.mxu3 %v1033_v6 }
  0x97   :  { %867 = vpow2.f32 %v844_v19  ;;  %678 = vmatpush.msrb.mxu2 %v1023_v4 }
  0x98   :  { %747 = vmatpush.msrb.mxu3 %v1039_v7 }
  0x99   :  { %679 = vmatpush.msrb.mxu2 %v1033_v6 }
  0x9b   :  { %v866_v17 = vpop.eup %865  ;;  %680 = vmatpush.msrb.mxu2 %v1039_v7 }
  0x9c   :  { %306 = vrot.lane.b32.xlu0 %v866_v17, %s955_s4 }
  0x9d   :  { %v868_v20 = vpop.eup %867 }
  0x9e   :  { %v283_v21 = vadd.f32 1.0, %v868_v20 }
  0xa0   :  { %869 = vrcp.f32 %v283_v21  ;;  %v295_v27 = vand.u32 2147483648, %v283_v21  ;;  %vm289_vm3 = vweird.f32 %v283_v21  ;;  %v293_v28 = vand.u32 2147483647, %v283_v21 }
  0xa2   :  { %v296_v30 = vor.u32 1.1754944e-38, %v295_v27  ;;  %vm294_vm5 = vcmp.eq.f32.partialorder %v293_v28, 8.507059e+37 }
  0xa4   :  { %301 = vrot.lane.b32.xlu0 %v253_v18, %s956_s3 }
  0xa6   :  { %v870_v22 = vpop.eup %869 }
  0xa7   :  { %v285_v23 = vmul.f32 %v870_v22, %v283_v21  ;;  %vm290_vm2 = vweird.f32 %v870_v22 }
  0xa8   :  { %vm291_vm4 = vmor %vm289_vm3, %vm290_vm2 }
  0xa9   :  { %v286_v24 = vsub.f32 1.0, %v285_v23 }
  0xab   :  { %v287_v25 = vmul.f32 %v870_v22, %v286_v24 }
  0xad   :  { %v288_v26 = vadd.f32 %v870_v22, %v287_v25 }
  0xaf   :  { %v292_v29 = vsel %vm291_vm4, %v870_v22, %v288_v26 }
  0xb0   :  { %v297_v32 = vsel %vm294_vm5, %v296_v30, %v292_v29 }
 0x10e   :  { %v307_v31 = vpop.permute.xlu0 %306 }
 0x10f   :  { %v309_v33 = vmul.f32 %v307_v31, %v297_v32  ;;  %v108_v17 = vpop.f32.mrf.mxu2 }
 0x110   :  { %v109_v18 = vadd.f32 %v1054_v9, %v108_v17 }
 0x111   :  { %311 = vrot.lane.b32.xlu1 %v309_v33, %s956_s3 }
 0x112   :  { %112 = vst [vmem:[#allocation2 + $0x4] sm:$0x3] %v109_v18 }
 0x116   :  { %v302_v34 = vpop.permute.xlu0 %301 }
 0x117   :  { %v304_v35 = vmul.f32 %v302_v34, %v297_v32  ;;  %v216_v19 = vpop.f32.mrf.mxu2 }
 0x118   :  { %v217_v20 = vadd.f32 %v1054_v9, %v216_v19 }
 0x119   :  { %v394_v21 = vld [vmem:[#allocation2 + $0x4] sm:$0x3] }
 0x11a   :  { %220 = vst [vmem:[#allocation2 + $0xc] sm:$0x3] %v217_v20 }
 0x183   :  { %v312_v36 = vpop.permute.xlu1 %311 }
 0x184   :  { %v314_v37 = vadd.f32 %v312_v36, %v304_v35 }
 0x186   :  { %871 = vtanh.f32 %v314_v37 }
 0x18c   :  { %v872_v38 = vpop.eup %871 }
 0x18d   :  { %317 = vrot.lane.b32.xlu1 %v872_v38, %s955_s4 }
 0x1ff   :  { %v318_v41 = vpop.permute.xlu1 %317 }
 0x200   :  { %v320_v42 = vmul.f32 %v318_v41, %v297_v32 }
 0x202   :  { %322 = vrot.lane.b32.xlu2 %v320_v42, %s956_s3 }
 0x25c   :  { %v323_v43 = vpop.permute.xlu2 %322 }
 0x25d   :  { %326 = vst.msk [vmem:[#allocation3] sm:$0x3] %vm325_vm6, %v323_v43  ;;  %845 = vmatmul.msk.f32.vlgmr.msra.gmra.mxu1 %vm255_vm1, %v323_v43 }
 0x2da   :  { %v347_v49 = vpop.f32.mrf.mxu1 }
 0x2db   :  { %v350_v50 = vadd.f32 %v347_v49, %v327_v48  ;;  %v135_v48 = vpop.f32.mrf.mxu3 }
 0x2dc   :  { %v136_v49 = vadd.f32 %v1054_v9, %v135_v48 }
 0x2dd   :  { %873 = vtanh.f32 %v350_v50  ;;  %v846_v52 = vmul.f32 -1.442695, %v350_v50 }
 0x2de   :  { %139 = vst [vmem:[#allocation2 + $0x6] sm:$0x3] %v136_v49 }
 0x2df   :  { %875 = vpow2.f32 %v846_v52 }
 0x2e3   :  { %v874_v51 = vpop.eup %873  ;;  %v243_v50 = vpop.f32.mrf.mxu3 }
 0x2e4   :  { %373 = vrot.lane.b32.xlu2 %v874_v51, %s955_s4  ;;  %v244_v51 = vadd.f32 %v1054_v9, %v243_v50 }
 0x2e5   :  { %v876_v53 = vpop.eup %875  ;;  %v461_v3 = vld [vmem:[#allocation2 + $0x6] sm:$0x3] }
 0x2e6   :  { %v354_v54 = vadd.f32 1.0, %v876_v53  ;;  %247 = vst [vmem:[#allocation2 + $0xe] sm:$0x3] %v244_v51 }
 0x2e8   :  { %877 = vrcp.f32 %v354_v54  ;;  %v366_v60 = vand.u32 2147483648, %v354_v54  ;;  %vm360_vm8 = vweird.f32 %v354_v54  ;;  %v364_v61 = vand.u32 2147483647, %v354_v54 }
 0x2ea   :  { %v367_v63 = vor.u32 1.1754944e-38, %v366_v60  ;;  %vm365_vm10 = vcmp.eq.f32.partialorder %v364_v61, 8.507059e+37 }
 0x2ee   :  { %v878_v55 = vpop.eup %877 }
 0x2ef   :  { %v356_v56 = vmul.f32 %v878_v55, %v354_v54  ;;  %vm361_vm7 = vweird.f32 %v878_v55 }
 0x2f0   :  { %vm362_vm9 = vmor %vm360_vm8, %vm361_vm7 }
 0x2f1   :  { %v357_v57 = vsub.f32 1.0, %v356_v56 }
 0x2f3   :  { %v358_v58 = vmul.f32 %v878_v55, %v357_v57 }
 0x2f5   :  { %v359_v59 = vadd.f32 %v878_v55, %v358_v58 }
 0x2f7   :  { %v363_v62 = vsel %vm362_vm9, %v878_v55, %v359_v59 }
 0x2f8   :  { %v368_v1 = vsel %vm365_vm10, %v367_v63, %v363_v62 }
 0x2f9   :  { %v371_v5 = vmul.f32 %v368_v1, %v314_v37 }
 0x33e   :  { %v374_v0 = vpop.permute.xlu2 %373 }
 0x33f   :  { %v376_v2 = vmul.f32 %v374_v0, %v368_v1 }
 0x341   :  { %378 = vrot.lane.b32.xlu0 %v376_v2, %s956_s3 }
 0x3b3   :  { %v379_v8 = vpop.permute.xlu0 %378 }
 0x3b4   :  { %v381_v10 = vadd.f32 %v379_v8, %v371_v5 }
 0x3b6   :  { %879 = vtanh.f32 %v381_v10 }
 0x3bc   :  { %v880_v11 = vpop.eup %879 }
 0x3bd   :  { %384 = vrot.lane.b32.xlu1 %v880_v11, %s955_s4 }
 0x42f   :  { %v385_v14 = vpop.permute.xlu1 %384 }
 0x430   :  { %v387_v15 = vmul.f32 %v385_v14, %v368_v1 }
 0x432   :  { %389 = vrot.lane.b32.xlu2 %v387_v15, %s956_s3  ;;  %v528_v15 = vld [vmem:[#allocation2 + $0x8] sm:$0x3] }
 0x48c   :  { %v390_v16 = vpop.permute.xlu2 %389 }
 0x48d   :  { %393 = vst.msk [vmem:[#allocation3 + $0x2] sm:$0x3] %vm325_vm6, %v390_v16  ;;  %847 = vmatmul.msk.f32.vlgmr.msra.gmra.mxu2 %vm255_vm1, %v390_v16 }
 0x510   :  { %v414_v22 = vpop.f32.mrf.mxu2 }
 0x511   :  { %v417_v23 = vadd.f32 %v414_v22, %v394_v21 }
 0x513   :  { %881 = vtanh.f32 %v417_v23  ;;  %v848_v25 = vmul.f32 -1.442695, %v417_v23 }
 0x515   :  { %883 = vpow2.f32 %v848_v25 }
 0x519   :  { %v882_v24 = vpop.eup %881 }
 0x51a   :  { %440 = vrot.lane.b32.xlu0 %v882_v24, %s955_s4 }
 0x51b   :  { %v884_v26 = vpop.eup %883 }
 0x51c   :  { %v421_v27 = vadd.f32 1.0, %v884_v26 }
 0x51e   :  { %885 = vrcp.f32 %v421_v27  ;;  %v433_v33 = vand.u32 2147483648, %v421_v27  ;;  %vm427_vm12 = vweird.f32 %v421_v27  ;;  %v431_v34 = vand.u32 2147483647, %v421_v27 }
 0x520   :  { %v434_v36 = vor.u32 1.1754944e-38, %v433_v33  ;;  %vm432_vm14 = vcmp.eq.f32.partialorder %v431_v34, 8.507059e+37 }
 0x524   :  { %v886_v28 = vpop.eup %885 }
 0x525   :  { %v423_v29 = vmul.f32 %v886_v28, %v421_v27  ;;  %vm428_vm11 = vweird.f32 %v886_v28 }
 0x526   :  { %vm429_vm13 = vmor %vm427_vm12, %vm428_vm11 }
 0x527   :  { %v424_v30 = vsub.f32 1.0, %v423_v29 }
 0x529   :  { %v425_v31 = vmul.f32 %v886_v28, %v424_v30 }
 0x52b   :  { %v426_v32 = vadd.f32 %v886_v28, %v425_v31 }
 0x52d   :  { %v430_v35 = vsel %vm429_vm13, %v886_v28, %v426_v32 }
 0x52e   :  { %v435_v38 = vsel %vm432_vm14, %v434_v36, %v430_v35 }
 0x52f   :  { %v438_v40 = vmul.f32 %v435_v38, %v381_v10 }
 0x58c   :  { %v441_v37 = vpop.permute.xlu0 %440 }
 0x58d   :  { %v443_v39 = vmul.f32 %v441_v37, %v435_v38 }
 0x58f   :  { %445 = vrot.lane.b32.xlu1 %v443_v39, %s956_s3 }
 0x601   :  { %v446_v41 = vpop.permute.xlu1 %445 }
 0x602   :  { %v448_v42 = vadd.f32 %v446_v41, %v438_v40  ;;  %v595_v41 = vld [vmem:[#allocation2 + $0xa] sm:$0x3] }
 0x604   :  { %887 = vtanh.f32 %v448_v42 }
 0x60a   :  { %v888_v43 = vpop.eup %887 }
 0x60b   :  { %451 = vrot.lane.b32.xlu2 %v888_v43, %s955_s4 }
 0x665   :  { %v452_v46 = vpop.permute.xlu2 %451 }
 0x666   :  { %v454_v47 = vmul.f32 %v452_v46, %v435_v38 }
 0x668   :  { %456 = vrot.lane.b32.xlu0 %v454_v47, %s956_s3 }
 0x6da   :  { %v457_v52 = vpop.permute.xlu0 %456 }
 0x6db   :  { %460 = vst.msk [vmem:[#allocation3 + $0x4] sm:$0x3] %vm325_vm6, %v457_v52  ;;  %849 = vmatmul.msk.f32.vlgmr.msra.gmra.mxu3 %vm255_vm1, %v457_v52 }
 0x75e   :  { %v481_v4 = vpop.f32.mrf.mxu3 }
 0x75f   :  { %v484_v6 = vadd.f32 %v481_v4, %v461_v3 }
 0x761   :  { %889 = vtanh.f32 %v484_v6  ;;  %v850_v53 = vmul.f32 -1.442695, %v484_v6 }
 0x763   :  { %891 = vpow2.f32 %v850_v53 }
 0x767   :  { %v890_v7 = vpop.eup %889 }
 0x768   :  { %507 = vrot.lane.b32.xlu1 %v890_v7, %s955_s4 }
 0x769   :  { %v892_v54 = vpop.eup %891 }
 0x76a   :  { %v488_v55 = vadd.f32 1.0, %v892_v54 }
 0x76c   :  { %893 = vrcp.f32 %v488_v55  ;;  %v500_v60 = vand.u32 2147483648, %v488_v55  ;;  %vm494_vm0 = vweird.f32 %v488_v55  ;;  %v498_v61 = vand.u32 2147483647, %v488_v55 }
 0x76e   :  { %v501_v63 = vor.u32 1.1754944e-38, %v500_v60  ;;  %vm499_vm3 = vcmp.eq.f32.partialorder %v498_v61, 8.507059e+37 }
 0x772   :  { %v894_v56 = vpop.eup %893 }
 0x773   :  { %v490_v9 = vmul.f32 %v894_v56, %v488_v55  ;;  %vm495_vm15 = vweird.f32 %v894_v56 }
 0x774   :  { %vm496_vm2 = vmor %vm494_vm0, %vm495_vm15 }
 0x775   :  { %v491_v57 = vsub.f32 1.0, %v490_v9 }
 0x777   :  { %v492_v58 = vmul.f32 %v894_v56, %v491_v57 }
 0x779   :  { %v493_v59 = vadd.f32 %v894_v56, %v492_v58 }
 0x77b   :  { %v497_v62 = vsel %vm496_vm2, %v894_v56, %v493_v59 }
 0x77c   :  { %v502_v1 = vsel %vm499_vm3, %v501_v63, %v497_v62  ;;  %v662_v62 = vld [vmem:[#allocation2 + $0xc] sm:$0x3] }
 0x77d   :  { %v505_v5 = vmul.f32 %v502_v1, %v448_v42 }
 0x7da   :  { %v508_v0 = vpop.permute.xlu1 %507 }
 0x7db   :  { %v510_v2 = vmul.f32 %v508_v0, %v502_v1 }
 0x7dd   :  { %512 = vrot.lane.b32.xlu2 %v510_v2, %s956_s3 }
 0x837   :  { %v513_v8 = vpop.permute.xlu2 %512 }
 0x838   :  { %v515_v10 = vadd.f32 %v513_v8, %v505_v5 }
 0x83a   :  { %895 = vtanh.f32 %v515_v10 }
 0x840   :  { %v896_v11 = vpop.eup %895 }
 0x841   :  { %518 = vrot.lane.b32.xlu0 %v896_v11, %s955_s4 }
 0x8b3   :  { %v519_v12 = vpop.permute.xlu0 %518 }
 0x8b4   :  { %v521_v13 = vmul.f32 %v519_v12, %v502_v1 }
 0x8b6   :  { %523 = vrot.lane.b32.xlu1 %v521_v13, %s956_s3 }
 0x928   :  { %v524_v14 = vpop.permute.xlu1 %523 }
 0x929   :  { %527 = vst.msk [vmem:[#allocation3 + $0x6] sm:$0x3] %vm325_vm6, %v524_v14  ;;  %851 = vmatmul.msk.f32.vlgmr.msrb.gmra.mxu0 %vm255_vm1, %v524_v14 }
 0x9a6   :  { %v548_v16 = vpop.f32.mrf.mxu0 }
 0x9a7   :  { %v551_v17 = vadd.f32 %v548_v16, %v528_v15 }
 0x9a9   :  { %897 = vtanh.f32 %v551_v17  ;;  %v852_v19 = vmul.f32 -1.442695, %v551_v17 }
 0x9ab   :  { %899 = vpow2.f32 %v852_v19 }
 0x9af   :  { %v898_v18 = vpop.eup %897 }
 0x9b0   :  { %574 = vrot.lane.b32.xlu2 %v898_v18, %s955_s4 }
 0x9b1   :  { %v900_v20 = vpop.eup %899 }
 0x9b2   :  { %v555_v21 = vadd.f32 1.0, %v900_v20 }
 0x9b4   :  { %901 = vrcp.f32 %v555_v21  ;;  %v567_v27 = vand.u32 2147483648, %v555_v21  ;;  %vm561_vm5 = vweird.f32 %v555_v21  ;;  %v565_v28 = vand.u32 2147483647, %v555_v21 }
 0x9b6   :  { %v568_v30 = vor.u32 1.1754944e-38, %v567_v27  ;;  %vm566_vm8 = vcmp.eq.f32.partialorder %v565_v28, 8.507059e+37 }
 0x9ba   :  { %v902_v22 = vpop.eup %901 }
 0x9bb   :  { %v557_v23 = vmul.f32 %v902_v22, %v555_v21  ;;  %vm562_vm4 = vweird.f32 %v902_v22 }
 0x9bc   :  { %vm563_vm7 = vmor %vm561_vm5, %vm562_vm4 }
 0x9bd   :  { %v558_v24 = vsub.f32 1.0, %v557_v23 }
 0x9bf   :  { %v559_v25 = vmul.f32 %v902_v22, %v558_v24 }
 0x9c1   :  { %v560_v26 = vadd.f32 %v902_v22, %v559_v25 }
 0x9c3   :  { %v564_v29 = vsel %vm563_vm7, %v902_v22, %v560_v26 }
 0x9c4   :  { %v569_v32 = vsel %vm566_vm8, %v568_v30, %v564_v29  ;;  %v729_v29 = vld [vmem:[#allocation2 + $0xe] sm:$0x3] }
 0x9c5   :  { %v572_v34 = vmul.f32 %v569_v32, %v515_v10 }
 0xa0a   :  { %v575_v31 = vpop.permute.xlu2 %574 }
 0xa0b   :  { %v577_v33 = vmul.f32 %v575_v31, %v569_v32 }
 0xa0d   :  { %579 = vrot.lane.b32.xlu0 %v577_v33, %s956_s3 }
 0xa7f   :  { %v580_v35 = vpop.permute.xlu0 %579 }
 0xa80   :  { %v582_v36 = vadd.f32 %v580_v35, %v572_v34 }
 0xa82   :  { %903 = vtanh.f32 %v582_v36 }
 0xa88   :  { %v904_v37 = vpop.eup %903 }
 0xa89   :  { %585 = vrot.lane.b32.xlu1 %v904_v37, %s955_s4 }
 0xafb   :  { %v586_v38 = vpop.permute.xlu1 %585 }
 0xafc   :  { %v588_v39 = vmul.f32 %v586_v38, %v569_v32 }
 0xafe   :  { %590 = vrot.lane.b32.xlu2 %v588_v39, %s956_s3 }
 0xb58   :  { %v591_v40 = vpop.permute.xlu2 %590 }
 0xb59   :  { %594 = vst.msk [vmem:[#allocation3 + $0x8] sm:$0x3] %vm325_vm6, %v591_v40  ;;  %853 = vmatmul.msk.f32.vlgmr.msrb.gmra.mxu1 %vm255_vm1, %v591_v40 }
 0xbd6   :  { %v615_v42 = vpop.f32.mrf.mxu1 }
 0xbd7   :  { %v618_v43 = vadd.f32 %v615_v42, %v595_v41 }
 0xbd9   :  { %905 = vtanh.f32 %v618_v43  ;;  %v854_v45 = vmul.f32 -1.442695, %v618_v43 }
 0xbdb   :  { %907 = vpow2.f32 %v854_v45 }
 0xbdf   :  { %v906_v44 = vpop.eup %905 }
 0xbe0   :  { %641 = vrot.lane.b32.xlu0 %v906_v44, %s955_s4 }
 0xbe1   :  { %v908_v46 = vpop.eup %907 }
 0xbe2   :  { %v622_v47 = vadd.f32 1.0, %v908_v46 }
 0xbe4   :  { %909 = vrcp.f32 %v622_v47  ;;  %v634_v3 = vand.u32 2147483648, %v622_v47  ;;  %vm628_vm10 = vweird.f32 %v622_v47  ;;  %v632_v4 = vand.u32 2147483647, %v622_v47 }
 0xbe6   :  { %v635_v7 = vor.u32 1.1754944e-38, %v634_v3  ;;  %vm633_vm12 = vcmp.eq.f32.partialorder %v632_v4, 8.507059e+37 }
 0xbea   :  { %v910_v48 = vpop.eup %909 }
 0xbeb   :  { %v624_v49 = vmul.f32 %v910_v48, %v622_v47  ;;  %vm629_vm9 = vweird.f32 %v910_v48 }
 0xbec   :  { %vm630_vm11 = vmor %vm628_vm10, %vm629_vm9 }
 0xbed   :  { %v625_v50 = vsub.f32 1.0, %v624_v49 }
 0xbef   :  { %v626_v51 = vmul.f32 %v910_v48, %v625_v50 }
 0xbf1   :  { %v627_v52 = vadd.f32 %v910_v48, %v626_v51 }
 0xbf3   :  { %v631_v6 = vsel %vm630_vm11, %v910_v48, %v627_v52 }
 0xbf4   :  { %v636_v54 = vsel %vm633_vm12, %v635_v7, %v631_v6 }
 0xbf5   :  { %v639_v56 = vmul.f32 %v636_v54, %v582_v36 }
 0xc52   :  { %v642_v53 = vpop.permute.xlu0 %641 }
 0xc53   :  { %v644_v55 = vmul.f32 %v642_v53, %v636_v54 }
 0xc55   :  { %646 = vrot.lane.b32.xlu1 %v644_v55, %s956_s3 }
 0xcc7   :  { %v647_v9 = vpop.permute.xlu1 %646 }
 0xcc8   :  { %v649_v57 = vadd.f32 %v647_v9, %v639_v56 }
 0xcca   :  { %911 = vtanh.f32 %v649_v57 }
 0xcd0   :  { %v912_v58 = vpop.eup %911 }
 0xcd1   :  { %652 = vrot.lane.b32.xlu2 %v912_v58, %s955_s4 }
 0xd2b   :  { %v653_v59 = vpop.permute.xlu2 %652 }
 0xd2c   :  { %v655_v60 = vmul.f32 %v653_v59, %v636_v54 }
 0xd2e   :  { %657 = vrot.lane.b32.xlu0 %v655_v60, %s956_s3 }
 0xda0   :  { %v658_v61 = vpop.permute.xlu0 %657 }
 0xda1   :  { %661 = vst.msk [vmem:[#allocation3 + $0xa] sm:$0x3] %vm325_vm6, %v658_v61  ;;  %855 = vmatmul.msk.f32.vlgmr.msrb.gmra.mxu2 %vm255_vm1, %v658_v61 }
 0xe24   :  { %v682_v63 = vpop.f32.mrf.mxu2 }
 0xe25   :  { %v685_v0 = vadd.f32 %v682_v63, %v662_v62 }
 0xe27   :  { %913 = vtanh.f32 %v685_v0  ;;  %v856_v2 = vmul.f32 -1.442695, %v685_v0 }
 0xe29   :  { %915 = vpow2.f32 %v856_v2 }
 0xe2d   :  { %v914_v1 = vpop.eup %913 }
 0xe2e   :  { %708 = vrot.lane.b32.xlu1 %v914_v1, %s955_s4 }
 0xe2f   :  { %v916_v5 = vpop.eup %915 }
 0xe30   :  { %v689_v8 = vadd.f32 1.0, %v916_v5 }
 0xe32   :  { %917 = vrcp.f32 %v689_v8  ;;  %v701_v15 = vand.u32 2147483648, %v689_v8  ;;  %vm695_vm14 = vweird.f32 %v689_v8  ;;  %v699_v16 = vand.u32 2147483647, %v689_v8 }
 0xe34   :  { %v702_v18 = vor.u32 1.1754944e-38, %v701_v15  ;;  %vm700_vm0 = vcmp.eq.f32.partialorder %v699_v16, 8.507059e+37 }
 0xe38   :  { %v918_v10 = vpop.eup %917 }
 0xe39   :  { %v691_v11 = vmul.f32 %v918_v10, %v689_v8  ;;  %vm696_vm13 = vweird.f32 %v918_v10 }
 0xe3a   :  { %vm697_vm15 = vmor %vm695_vm14, %vm696_vm13 }
 0xe3b   :  { %v692_v12 = vsub.f32 1.0, %v691_v11 }
 0xe3d   :  { %v693_v13 = vmul.f32 %v918_v10, %v692_v12 }
 0xe3f   :  { %v694_v14 = vadd.f32 %v918_v10, %v693_v13 }
 0xe41   :  { %v698_v17 = vsel %vm697_vm15, %v918_v10, %v694_v14 }
 0xe42   :  { %v703_v20 = vsel %vm700_vm0, %v702_v18, %v698_v17 }
 0xe43   :  { %v706_v22 = vmul.f32 %v703_v20, %v649_v57 }
 0xea0   :  { %v709_v19 = vpop.permute.xlu1 %708 }
 0xea1   :  { %v711_v21 = vmul.f32 %v709_v19, %v703_v20 }
 0xea3   :  { %713 = vrot.lane.b32.xlu2 %v711_v21, %s956_s3 }
 0xefd   :  { %v714_v23 = vpop.permute.xlu2 %713 }
 0xefe   :  { %v716_v24 = vadd.f32 %v714_v23, %v706_v22 }
 0xf00   :  { %919 = vtanh.f32 %v716_v24 }
 0xf06   :  { %v920_v25 = vpop.eup %919 }
 0xf07   :  { %719 = vrot.lane.b32.xlu0 %v920_v25, %s955_s4 }
 0xf79   :  { %v720_v26 = vpop.permute.xlu0 %719 }
 0xf7a   :  { %v722_v27 = vmul.f32 %v720_v26, %v703_v20 }
 0xf7c   :  { %724 = vrot.lane.b32.xlu1 %v722_v27, %s956_s3 }
 0xfee   :  { %v725_v28 = vpop.permute.xlu1 %724 }
 0xfef   :  { %728 = vst.msk [vmem:[#allocation3 + $0xc] sm:$0x3] %vm325_vm6, %v725_v28  ;;  %857 = vmatmul.msk.f32.vlgmr.msrb.gmra.mxu3 %vm255_vm1, %v725_v28 }
0x1072   :  { %v749_v30 = vpop.f32.mrf.mxu3 }
0x1073   :  { %v752_v31 = vadd.f32 %v749_v30, %v729_v29 }
0x1075   :  { %921 = vtanh.f32 %v752_v31  ;;  %v858_v33 = vmul.f32 -1.442695, %v752_v31 }
0x1077   :  { %923 = vpow2.f32 %v858_v33 }
0x107b   :  { %v922_v32 = vpop.eup %921 }
0x107c   :  { %775 = vrot.lane.b32.xlu2 %v922_v32, %s955_s4 }
0x107d   :  { %v924_v34 = vpop.eup %923 }
0x107e   :  { %v756_v35 = vadd.f32 1.0, %v924_v34 }
0x1080   :  { %925 = vrcp.f32 %v756_v35  ;;  %v768_v41 = vand.u32 2147483648, %v756_v35  ;;  %vm762_vm1 = vweird.f32 %v756_v35  ;;  %v766_v42 = vand.u32 2147483647, %v756_v35 }
0x1082   :  { %v769_v44 = vor.u32 1.1754944e-38, %v768_v41  ;;  %vm767_vm4 = vcmp.eq.f32.partialorder %v766_v42, 8.507059e+37 }
0x1086   :  { %v926_v36 = vpop.eup %925 }
0x1087   :  { %v758_v37 = vmul.f32 %v926_v36, %v756_v35  ;;  %vm763_vm2 = vweird.f32 %v926_v36 }
0x1088   :  { %vm764_vm3 = vmor %vm762_vm1, %vm763_vm2 }
0x1089   :  { %v759_v38 = vsub.f32 1.0, %v758_v37 }
0x108b   :  { %v760_v39 = vmul.f32 %v926_v36, %v759_v38 }
0x108d   :  { %v761_v40 = vadd.f32 %v926_v36, %v760_v39 }
0x108f   :  { %v765_v43 = vsel %vm764_vm3, %v926_v36, %v761_v40 }
0x1090   :  { %v770_v46 = vsel %vm767_vm4, %v769_v44, %v765_v43 }
0x1091   :  { %v773_v48 = vmul.f32 %v770_v46, %v716_v24 }
0x10d6   :  { %v776_v45 = vpop.permute.xlu2 %775 }
0x10d7   :  { %v778_v47 = vmul.f32 %v776_v45, %v770_v46 }
0x10d9   :  { %780 = vrot.lane.b32.xlu0 %v778_v47, %s956_s3 }
0x114b   :  { %v781_v49 = vpop.permute.xlu0 %780 }
0x114c   :  { %v783_v50 = vadd.f32 %v781_v49, %v773_v48 }
0x114e   :  { %927 = vtanh.f32 %v783_v50  ;;  %798 = vrot.lane.b32.xlu0 %v783_v50, %s957_s0 }
0x1154   :  { %v928_v51 = vpop.eup %927 }
0x1155   :  { %786 = vrot.lane.b32.xlu1 %v928_v51, %s955_s4 }
0x11c0   :  { %v799_v52 = vpop.permute.xlu0 %798 }
0x11c1   :  { %801 = vst.msk [vmem:[%s1184_s8] sm:$0x3] %vm325_vm6, %v799_v52  ;;  %s959_s8 = smov 2  }
0x11c7   :  { %v787_v3 = vpop.permute.xlu1 %786 }
0x11c8   :  { %v789_v4 = vmul.f32 %v787_v3, %v770_v46 }
0x11ca   :  { %791 = vrot.lane.b32.xlu2 %v789_v4, %s956_s3 }
0x1224   :  { %v792_v6 = vpop.permute.xlu2 %791 }
0x1225   :  { %795 = vst.msk [vmem:[#allocation3 + $0xe] sm:$0x3] %vm325_vm6, %v792_v6 }
0x1226   :  { %796 = vst.msk [vmem:[%s1183_s7] sm:$0x3] %vm325_vm6, %v792_v6 }
0x1227   :  { %814 = dma.vmem_to_hbm [thread:$0]  %s807_s16, 256, %s809_s19, [#allocation4], %s956_s3, %s956_s3, %s959_s8  }
0x1228   :  { %953 = dma.done.wait [#allocation4], 256  }
0x1229   :  { %954 = vsyncadd [#allocation4], 4294967040 }
0x122a   :  { %827 = vsyncpa [#allocation4], 1 }

</bundles_post_ra>
